<compile_context>
chip_gen: v7x
topology: tpu7x:2x2x1
jax: 0.10.0
libtpu: 0.0.40
codegen_flags: <defaults>
</compile_context>

<pallas_src>
import numpy as np
import jax
import jax.numpy as jnp
from jax import lax
from jax.experimental import pallas as pl
from jax.experimental.pallas import tpu as pltpu


def _make_kernel(bt, Tm1, I, H, HH, O, n_steps):
    del Tm1, HH, O  # shapes are carried by the refs

    def kernel(idx_ref, frac_ref, dt_ref,            # SMEM: (n_steps*4,) i32, (n_steps*4,) f32, (n_steps,) f32
               fidx_ref,                             # VMEM (bt, 1) int32  -- RK4-grid index of the final time
               b_ref, c2_ref, d3_ref,                # VMEM (T-1, bt, I) each (time-major spline derivative coeffs)
               x0_ref,                               # VMEM (bt, I)        -- spline.evaluate(times[0])
               w0_ref, b0_ref,                       # (I, H), (1, H)      initial_network
               win_ref, bin_ref,                     # (H, HH), (1, HH)    func.linear_in
               wout_ref, bout_ref,                   # (HH, I*H), (1, I*H) func.linear_out (i-major columns)
               wl_ref, bl_ref,                       # (H, O), (1, O)      final linear
               out_ref):                             # VMEM (bt, O)
        win = win_ref[...]
        bin_b = bin_ref[...]
        wout = wout_ref[...]
        bout_b = bout_ref[...]
        fidx = fidx_ref[...]                         # (bt, 1) int32

        def vector_field(p, z):
            # spline derivative dX/dt at precomputed stage p (interval index + frac come from SMEM)
            iv = idx_ref[p]
            frac = frac_ref[p]
            dx = b_ref[iv] + (c2_ref[iv] + d3_ref[iv] * frac) * frac            # (bt, I)
            # FinalTanh vector field
            hid = jnp.maximum(
                jnp.dot(z, win, preferred_element_type=jnp.float32) + bin_b, 0.0)
            f = jnp.tanh(
                jnp.dot(hid, wout, preferred_element_type=jnp.float32) + bout_b)  # (bt, I*H), i-major
            # f(z) . dX/dt : I static lane slices, broadcast-multiply, sum (pure VPU, no selector matmuls)
            out = f[:, 0:H] * dx[:, 0:1]
            for i in range(1, I):
                out = out + f[:, i * H:(i + 1) * H] * dx[:, i:i + 1]
            return out                                                           # (bt, H)

        # z0 = initial_network(spline.evaluate(times[0]))
        z0 = jnp.dot(x0_ref[...], w0_ref[...], preferred_element_type=jnp.float32) + b0_ref[...]
        zf0 = jnp.where(fidx == 0, z0, jnp.zeros_like(z0))

        def body(k, carry):
            z, zf = carry
            dt = dt_ref[k]
            p = k * 4
            # torchdiffeq fixed-grid 'rk4' step (3/8 rule, rk4_alt_step_func)
            k1 = vector_field(p, z)
            k2 = vector_field(p + 1, z + dt * k1 * (1.0 / 3.0))
            k3 = vector_field(p + 2, z + dt * (k2 - k1 * (1.0 / 3.0)))
            k4 = vector_field(p + 3, z + dt * (k1 - k2 + k3))
            z_new = z + dt * (k1 + 3.0 * (k2 + k3) + k4) * 0.125
            # select z at each batch element's final time while streaming (no zall scratch / gather)
            zf_new = jnp.where(fidx == k + 1, z_new, zf)
            return z_new, zf_new

        _, zf = lax.fori_loop(0, n_steps, body, (z0, zf0))

        out_ref[...] = (jnp.dot(zf, wl_ref[...], preferred_element_type=jnp.float32)
                        + bl_ref[...]).astype(out_ref.dtype)

    return kernel


def neural_cde_forward(times, coeffs, final_index, params, *, batch_tile=None):
    """pred_y, 0 = NeuralCDE(times, terminal_time, coeffs, final_index)."""
    a, b, c2, d3 = coeffs                     # each (B, T-1, I) -- PyTorch spline-coeff layout
    B, Tm1, I = a.shape
    T = Tm1 + 1
    assert tuple(final_index.shape) == (B,), "coeff.shape[:-2] must equal final_index.shape"

    # ---- host-side RK4 / spline schedule (review: move index math + scalar extraction off-kernel) ----
    times_np = np.asarray(times, dtype=np.float64)
    t0 = float(times_np[0])
    t_end = float(times_np[-1])
    h = float(np.min(np.diff(times_np)))                               # options['step_size']
    n_steps = int(np.ceil((t_end - t0) / h))

    fidx_np = np.asarray(final_index)
    grid_pos = (times_np[fidx_np] - t0) / h
    fidx_grid = np.rint(grid_pos).astype(np.int32)
    assert np.allclose(grid_pos, fidx_grid), "final times must land on the RK4 grid"

    steps = np.arange(n_steps, dtype=np.float64)
    tn = t0 + steps * h
    dt_np = np.clip(np.minimum(h, t_end - tn), 0.0, None)              # clamp >= 0 (review concern)
    stage_c = np.array([0.0, 1.0 / 3.0, 2.0 / 3.0, 1.0], dtype=np.float64)
    s = tn[:, None] + dt_np[:, None] * stage_c[None, :]                # (n_steps, 4) stage times
    idx_np = np.clip((s[:, :, None] > times_np[None, None, :]).sum(-1) - 1, 0, Tm1 - 1)
    frac_np = s - times_np[idx_np]

    idx_tab = jnp.asarray(idx_np.reshape(-1), jnp.int32)               # (n_steps*4,)
    frac_tab = jnp.asarray(frac_np.reshape(-1), jnp.float32)           # (n_steps*4,)
    dt_tab = jnp.asarray(dt_np, jnp.float32)                           # (n_steps,)

    H = params["w0"].shape[1]
    HH = params["win"].shape[1]
    O = params["wl"].shape[1]
    HI = H * I

    # linear_out columns: h-major (h*I + i) -> i-major (i*H + h) so the contraction needs no E/R matmuls
    wout_im = jnp.reshape(jnp.transpose(jnp.reshape(jnp.asarray(params["wout"], jnp.float32),
                                                    (HH, H, I)), (0, 2, 1)), (HH, HI))
    bout_im = jnp.reshape(jnp.transpose(jnp.reshape(jnp.asarray(params["bout"], jnp.float32),
                                                    (1, H, I)), (0, 2, 1)), (1, HI))

    # time-major (T-1, B, I) so the interval axis is dynamically indexable in-kernel
    b_t = jnp.transpose(jnp.asarray(b, jnp.float32), (1, 0, 2))
    c_t = jnp.transpose(jnp.asarray(c2, jnp.float32), (1, 0, 2))
    d_t = jnp.transpose(jnp.asarray(d3, jnp.float32), (1, 0, 2))
    x0 = jnp.asarray(a[:, 0, :], jnp.float32)                          # spline.evaluate(times[0])
    fidx2 = jnp.asarray(fidx_grid, jnp.int32).reshape(B, 1)

    # batch tiling: split across TensorCores on v7x, keep (8,128)-legal sublane blocks
    if batch_tile is None:
        bt = B // 2 if (B % 2 == 0 and (B // 2) % 8 == 0) else B
    else:
        bt = batch_tile
    assert B % bt == 0 and (bt % 8 == 0 or bt == B), "batch tile must be sublane-legal"
    n_tiles = B // bt

    kernel = _make_kernel(bt, Tm1, I, H, HH, O, n_steps)

    def smem():
        return pl.BlockSpec(memory_space=pltpu.MemorySpace.SMEM)

    def rep(shape):
        return pl.BlockSpec(shape, lambda i: (0,) * len(shape))        # replicated (weights)

    grid_spec = pltpu.PrefetchScalarGridSpec(
        num_scalar_prefetch=0,
        grid=(n_tiles,),
        in_specs=[
            smem(), smem(), smem(),                                    # idx_tab, frac_tab, dt_tab
            pl.BlockSpec((bt, 1), lambda i: (i, 0)),                   # fidx
            pl.BlockSpec((Tm1, bt, I), lambda i: (0, i, 0)),           # b
            pl.BlockSpec((Tm1, bt, I), lambda i: (0, i, 0)),           # two_c
            pl.BlockSpec((Tm1, bt, I), lambda i: (0, i, 0)),           # three_d
            pl.BlockSpec((bt, I), lambda i: (i, 0)),                   # x0
            rep((I, H)), rep((1, H)),                                  # initial_network
            rep((H, HH)), rep((1, HH)),                                # linear_in
            rep((HH, HI)), rep((1, HI)),                               # linear_out (i-major)
            rep((H, O)), rep((1, O)),                                  # final linear
        ],
        out_specs=pl.BlockSpec((bt, O), lambda i: (i, 0)),
    )

    pred = pl.pallas_call(
        kernel,
        out_shape=jax.ShapeDtypeStruct((B, O), jnp.float32),
        grid_spec=grid_spec,
        compiler_params=pltpu.CompilerParams(dimension_semantics=("parallel",)),
    )(idx_tab, frac_tab, dt_tab, fidx2,
      b_t, c_t, d_t, x0,
      jnp.asarray(params["w0"], jnp.float32), jnp.asarray(params["b0"], jnp.float32),
      jnp.asarray(params["win"], jnp.float32), jnp.asarray(params["bin"], jnp.float32),
      wout_im, bout_im,
      jnp.asarray(params["wl"], jnp.float32), jnp.asarray(params["bl"], jnp.float32))
    return pred, 0


if __name__ == "__main__":
    # small shapes: batch=16 (2 tiles of 8 -> 2 grid points, one per v7x TensorCore),
    # input_channels=4, hidden=32, hidden_hidden=32, output=2, seq=8
    B, I, H, HH, O, T = 16, 4, 32, 32, 2, 8
    key = jax.random.PRNGKey(0)
    ks = jax.random.split(key, 13)

    def uni(k, shape, fan_in):
        bound = 1.0 / np.sqrt(fan_in)
        return jax.random.uniform(k, shape, jnp.float32, -bound, bound)

    params = dict(
        w0=uni(ks[0], (I, H), I),         b0=uni(ks[1], (1, H), I),           # initial_network
        win=uni(ks[2], (H, HH), H),       bin=uni(ks[3], (1, HH), H),         # func.linear_in
        wout=uni(ks[4], (HH, H * I), HH), bout=uni(ks[5], (1, H * I), HH),    # func.linear_out (h-major)
        wl=uni(ks[6], (H, O), H),         bl=uni(ks[7], (1, O), H),           # final linear
    )

    times = jnp.arange(T, dtype=jnp.float32)
    a = jax.random.normal(ks[8], (B, T - 1, I), jnp.float32)
    b = 0.10 * jax.random.normal(ks[9], (B, T - 1, I), jnp.float32)
    c2 = 0.05 * jax.random.normal(ks[10], (B, T - 1, I), jnp.float32)
    d3 = 0.02 * jax.random.normal(ks[11], (B, T - 1, I), jnp.float32)
    final_index = jax.random.randint(ks[12], (B,), 0, T, dtype=jnp.int32)

    pred_y, _ = neural_cde_forward(times, (a, b, c2, d3), final_index, params)
    jax.block_until_ready(pred_y)
    assert pred_y.shape == (B, O) and pred_y.dtype == jnp.float32
    assert bool(jnp.all(jnp.isfinite(pred_y)))
    print("KERNEL_OK")
</pallas_src>

<mosaic_0001>
module attributes {stable_mosaic.version = 11 : i64} {
  func.func @kernel(%arg0: i32, %arg1: memref<28xi32, #tpu.memory_space<smem>>, %arg2: memref<28xf32, #tpu.memory_space<smem>>, %arg3: memref<7xf32, #tpu.memory_space<smem>>, %arg4: memref<8x1xi32, #tpu.memory_space<vmem>>, %arg5: memref<7x8x4xf32, #tpu.memory_space<vmem>>, %arg6: memref<7x8x4xf32, #tpu.memory_space<vmem>>, %arg7: memref<7x8x4xf32, #tpu.memory_space<vmem>>, %arg8: memref<8x4xf32, #tpu.memory_space<vmem>>, %arg9: memref<4x32xf32, #tpu.memory_space<vmem>>, %arg10: memref<1x32xf32, #tpu.memory_space<vmem>>, %arg11: memref<32x32xf32, #tpu.memory_space<vmem>>, %arg12: memref<1x32xf32, #tpu.memory_space<vmem>>, %arg13: memref<32x128xf32, #tpu.memory_space<vmem>>, %arg14: memref<1x128xf32, #tpu.memory_space<vmem>>, %arg15: memref<32x2xf32, #tpu.memory_space<vmem>>, %arg16: memref<1x2xf32, #tpu.memory_space<vmem>>, %arg17: memref<8x2xf32, #tpu.memory_space<vmem>>) attributes {dimension_semantics = [#tpu.dimension_semantics<parallel>], iteration_bounds = array<i64: 2>, scalar_prefetch = 0 : i64, scratch_operands = 0 : i64, tpu.core_type = #tpu.core_type<tc>, window_params = [{transform_indices = @transform_0, window_bounds = array<i64: 28>}, {transform_indices = @transform_1, window_bounds = array<i64: 28>}, {transform_indices = @transform_2, window_bounds = array<i64: 7>}, {transform_indices = @transform_3, window_bounds = array<i64: 8, 1>}, {transform_indices = @transform_4, window_bounds = array<i64: 7, 8, 4>}, {transform_indices = @transform_5, window_bounds = array<i64: 7, 8, 4>}, {transform_indices = @transform_6, window_bounds = array<i64: 7, 8, 4>}, {transform_indices = @transform_7, window_bounds = array<i64: 8, 4>}, {pipeline_mode = #tpu.pipeline_mode<synchronous>, transform_indices = @transform_8, window_bounds = array<i64: 4, 32>}, {pipeline_mode = #tpu.pipeline_mode<synchronous>, transform_indices = @transform_9, window_bounds = array<i64: 1, 32>}, {pipeline_mode = #tpu.pipeline_mode<synchronous>, transform_indices = @transform_10, window_bounds = array<i64: 32, 32>}, {pipeline_mode = #tpu.pipeline_mode<synchronous>, transform_indices = @transform_11, window_bounds = array<i64: 1, 32>}, {pipeline_mode = #tpu.pipeline_mode<synchronous>, transform_indices = @transform_12, window_bounds = array<i64: 32, 128>}, {pipeline_mode = #tpu.pipeline_mode<synchronous>, transform_indices = @transform_13, window_bounds = array<i64: 1, 128>}, {pipeline_mode = #tpu.pipeline_mode<synchronous>, transform_indices = @transform_14, window_bounds = array<i64: 32, 2>}, {pipeline_mode = #tpu.pipeline_mode<synchronous>, transform_indices = @transform_15, window_bounds = array<i64: 1, 2>}, {transform_indices = @transform_16, window_bounds = array<i64: 8, 2>}]} {
    %c0 = arith.constant 0 : index
    %c0_0 = arith.constant 0 : index
    %0 = vector.load %arg11[%c0, %c0_0] : memref<32x32xf32, #tpu.memory_space<vmem>>, vector<32x32xf32>
    %c0_1 = arith.constant 0 : index
    %c0_2 = arith.constant 0 : index
    %1 = vector.load %arg12[%c0_1, %c0_2] : memref<1x32xf32, #tpu.memory_space<vmem>>, vector<1x32xf32>
    %c0_3 = arith.constant 0 : index
    %c0_4 = arith.constant 0 : index
    %2 = vector.load %arg13[%c0_3, %c0_4] : memref<32x128xf32, #tpu.memory_space<vmem>>, vector<32x128xf32>
    %c0_5 = arith.constant 0 : index
    %c0_6 = arith.constant 0 : index
    %3 = vector.load %arg14[%c0_5, %c0_6] : memref<1x128xf32, #tpu.memory_space<vmem>>, vector<1x128xf32>
    %c0_7 = arith.constant 0 : index
    %c0_8 = arith.constant 0 : index
    %4 = vector.load %arg4[%c0_7, %c0_8] : memref<8x1xi32, #tpu.memory_space<vmem>>, vector<8x1xi32>
    %c0_9 = arith.constant 0 : index
    %c0_10 = arith.constant 0 : index
    %5 = vector.load %arg8[%c0_9, %c0_10] : memref<8x4xf32, #tpu.memory_space<vmem>>, vector<8x4xf32>
    %c0_11 = arith.constant 0 : index
    %c0_12 = arith.constant 0 : index
    %6 = vector.load %arg9[%c0_11, %c0_12] : memref<4x32xf32, #tpu.memory_space<vmem>>, vector<4x32xf32>
    %cst = arith.constant dense<0.000000e+00> : vector<8x32xf32>
    %7 = tpu.matmul %5, %6, %cst {dimension_numbers = #tpu.dot_dimension_numbers<[1], [0], [0], [1], [0, 0, 1, 1], [], []>} : vector<8x4xf32>, vector<4x32xf32>, vector<8x32xf32> -> vector<8x32xf32>
    %c0_13 = arith.constant 0 : index
    %c0_14 = arith.constant 0 : index
    %8 = vector.load %arg10[%c0_13, %c0_14] : memref<1x32xf32, #tpu.memory_space<vmem>>, vector<1x32xf32>
    %9 = vector.broadcast %8 : vector<1x32xf32> to vector<8x32xf32>
    %10 = arith.addf %7, %9 : vector<8x32xf32>
    %c0_i32 = arith.constant 0 : i32
    %11 = vector.broadcast %c0_i32 : i32 to vector<8x1xi32>
    %12 = arith.cmpi eq, %4, %11 : vector<8x1xi32>
    %cst_15 = arith.constant 0.000000e+00 : f32
    %13 = vector.broadcast %cst_15 : f32 to vector<8x32xf32>
    %14 = vector.shape_cast %12 : vector<8x1xi1> to vector<8x1xi1>
    %15 = vector.broadcast %14 : vector<8x1xi1> to vector<8x32xi1>
    %16 = arith.select %15, %10, %13 : vector<8x32xi1>, vector<8x32xf32>
    %c0_i32_16 = arith.constant 0 : i32
    %c7_i32 = arith.constant 7 : i32
    %17 = arith.addi %c0_i32_16, %c7_i32 : i32
    %c1_i32 = arith.constant 1 : i32
    %18:2 = scf.for %arg18 = %c0_i32_16 to %17 step %c1_i32 iter_args(%arg19 = %10, %arg20 = %16) -> (vector<8x32xf32>, vector<8x32xf32>)  : i32 {
      %25 = arith.index_cast %arg18 : i32 to index
      %26 = memref.load %arg3[%25] : memref<7xf32, #tpu.memory_space<smem>>
      %c4_i32 = arith.constant 4 : i32
      %27 = arith.muli %arg18, %c4_i32 : i32
      %28 = arith.index_cast %27 : i32 to index
      %29 = memref.load %arg1[%28] : memref<28xi32, #tpu.memory_space<smem>>
      %30 = arith.index_cast %27 : i32 to index
      %31 = memref.load %arg2[%30] : memref<28xf32, #tpu.memory_space<smem>>
      %32 = arith.index_cast %29 : i32 to index
      %c0_25 = arith.constant 0 : index
      %c0_26 = arith.constant 0 : index
      %33 = vector.load %arg5[%32, %c0_25, %c0_26] : memref<7x8x4xf32, #tpu.memory_space<vmem>>, vector<1x8x4xf32>
      %34 = vector.shape_cast %33 : vector<1x8x4xf32> to vector<8x4xf32>
      %35 = arith.index_cast %29 : i32 to index
      %c0_27 = arith.constant 0 : index
      %c0_28 = arith.constant 0 : index
      %36 = vector.load %arg6[%35, %c0_27, %c0_28] : memref<7x8x4xf32, #tpu.memory_space<vmem>>, vector<1x8x4xf32>
      %37 = vector.shape_cast %36 : vector<1x8x4xf32> to vector<8x4xf32>
      %38 = arith.index_cast %29 : i32 to index
      %c0_29 = arith.constant 0 : index
      %c0_30 = arith.constant 0 : index
      %39 = vector.load %arg7[%38, %c0_29, %c0_30] : memref<7x8x4xf32, #tpu.memory_space<vmem>>, vector<1x8x4xf32>
      %40 = vector.shape_cast %39 : vector<1x8x4xf32> to vector<8x4xf32>
      %41 = vector.broadcast %31 : f32 to vector<8x4xf32>
      %42 = arith.mulf %40, %41 : vector<8x4xf32>
      %43 = arith.addf %37, %42 : vector<8x4xf32>
      %44 = vector.broadcast %31 : f32 to vector<8x4xf32>
      %45 = arith.mulf %43, %44 : vector<8x4xf32>
      %46 = arith.addf %34, %45 : vector<8x4xf32>
      %cst_31 = arith.constant dense<0.000000e+00> : vector<8x32xf32>
      %47 = tpu.matmul %arg19, %0, %cst_31 {dimension_numbers = #tpu.dot_dimension_numbers<[1], [0], [0], [1], [0, 0, 1, 1], [], []>} : vector<8x32xf32>, vector<32x32xf32>, vector<8x32xf32> -> vector<8x32xf32>
      %48 = vector.broadcast %1 : vector<1x32xf32> to vector<8x32xf32>
      %49 = arith.addf %47, %48 : vector<8x32xf32>
      %cst_32 = arith.constant 0.000000e+00 : f32
      %50 = vector.broadcast %cst_32 : f32 to vector<8x32xf32>
      %51 = arith.maximumf %49, %50 : vector<8x32xf32>
      %cst_33 = arith.constant dense<0.000000e+00> : vector<8x128xf32>
      %52 = tpu.matmul %51, %2, %cst_33 {dimension_numbers = #tpu.dot_dimension_numbers<[1], [0], [0], [1], [0, 0, 1, 1], [], []>} : vector<8x32xf32>, vector<32x128xf32>, vector<8x128xf32> -> vector<8x128xf32>
      %53 = vector.broadcast %3 : vector<1x128xf32> to vector<8x128xf32>
      %54 = arith.addf %52, %53 : vector<8x128xf32>
      %55 = math.tanh %54 : vector<8x128xf32>
      %56 = vector.extract_strided_slice %55 {offsets = [0, 0], sizes = [8, 32], strides = [1, 1]} : vector<8x128xf32> to vector<8x32xf32>
      %57 = vector.extract_strided_slice %46 {offsets = [0, 0], sizes = [8, 1], strides = [1, 1]} : vector<8x4xf32> to vector<8x1xf32>
      %58 = vector.broadcast %57 : vector<8x1xf32> to vector<8x32xf32>
      %59 = arith.mulf %56, %58 : vector<8x32xf32>
      %60 = vector.extract_strided_slice %55 {offsets = [0, 32], sizes = [8, 32], strides = [1, 1]} : vector<8x128xf32> to vector<8x32xf32>
      %61 = vector.extract_strided_slice %46 {offsets = [0, 1], sizes = [8, 1], strides = [1, 1]} : vector<8x4xf32> to vector<8x1xf32>
      %62 = vector.broadcast %61 : vector<8x1xf32> to vector<8x32xf32>
      %63 = arith.mulf %60, %62 : vector<8x32xf32>
      %64 = arith.addf %59, %63 : vector<8x32xf32>
      %65 = vector.extract_strided_slice %55 {offsets = [0, 64], sizes = [8, 32], strides = [1, 1]} : vector<8x128xf32> to vector<8x32xf32>
      %66 = vector.extract_strided_slice %46 {offsets = [0, 2], sizes = [8, 1], strides = [1, 1]} : vector<8x4xf32> to vector<8x1xf32>
      %67 = vector.broadcast %66 : vector<8x1xf32> to vector<8x32xf32>
      %68 = arith.mulf %65, %67 : vector<8x32xf32>
      %69 = arith.addf %64, %68 : vector<8x32xf32>
      %70 = vector.extract_strided_slice %55 {offsets = [0, 96], sizes = [8, 32], strides = [1, 1]} : vector<8x128xf32> to vector<8x32xf32>
      %71 = vector.extract_strided_slice %46 {offsets = [0, 3], sizes = [8, 1], strides = [1, 1]} : vector<8x4xf32> to vector<8x1xf32>
      %72 = vector.broadcast %71 : vector<8x1xf32> to vector<8x32xf32>
      %73 = arith.mulf %70, %72 : vector<8x32xf32>
      %74 = arith.addf %69, %73 : vector<8x32xf32>
      %c1_i32_34 = arith.constant 1 : i32
      %75 = arith.addi %27, %c1_i32_34 : i32
      %76 = vector.broadcast %26 : f32 to vector<8x32xf32>
      %77 = arith.mulf %76, %74 : vector<8x32xf32>
      %cst_35 = arith.constant 0.333333343 : f32
      %78 = vector.broadcast %cst_35 : f32 to vector<8x32xf32>
      %79 = arith.mulf %77, %78 : vector<8x32xf32>
      %80 = arith.addf %arg19, %79 : vector<8x32xf32>
      %81 = arith.index_cast %75 : i32 to index
      %82 = memref.load %arg1[%81] : memref<28xi32, #tpu.memory_space<smem>>
      %83 = arith.index_cast %75 : i32 to index
      %84 = memref.load %arg2[%83] : memref<28xf32, #tpu.memory_space<smem>>
      %85 = arith.index_cast %82 : i32 to index
      %c0_36 = arith.constant 0 : index
      %c0_37 = arith.constant 0 : index
      %86 = vector.load %arg5[%85, %c0_36, %c0_37] : memref<7x8x4xf32, #tpu.memory_space<vmem>>, vector<1x8x4xf32>
      %87 = vector.shape_cast %86 : vector<1x8x4xf32> to vector<8x4xf32>
      %88 = arith.index_cast %82 : i32 to index
      %c0_38 = arith.constant 0 : index
      %c0_39 = arith.constant 0 : index
      %89 = vector.load %arg6[%88, %c0_38, %c0_39] : memref<7x8x4xf32, #tpu.memory_space<vmem>>, vector<1x8x4xf32>
      %90 = vector.shape_cast %89 : vector<1x8x4xf32> to vector<8x4xf32>
      %91 = arith.index_cast %82 : i32 to index
      %c0_40 = arith.constant 0 : index
      %c0_41 = arith.constant 0 : index
      %92 = vector.load %arg7[%91, %c0_40, %c0_41] : memref<7x8x4xf32, #tpu.memory_space<vmem>>, vector<1x8x4xf32>
      %93 = vector.shape_cast %92 : vector<1x8x4xf32> to vector<8x4xf32>
      %94 = vector.broadcast %84 : f32 to vector<8x4xf32>
      %95 = arith.mulf %93, %94 : vector<8x4xf32>
      %96 = arith.addf %90, %95 : vector<8x4xf32>
      %97 = vector.broadcast %84 : f32 to vector<8x4xf32>
      %98 = arith.mulf %96, %97 : vector<8x4xf32>
      %99 = arith.addf %87, %98 : vector<8x4xf32>
      %cst_42 = arith.constant dense<0.000000e+00> : vector<8x32xf32>
      %100 = tpu.matmul %80, %0, %cst_42 {dimension_numbers = #tpu.dot_dimension_numbers<[1], [0], [0], [1], [0, 0, 1, 1], [], []>} : vector<8x32xf32>, vector<32x32xf32>, vector<8x32xf32> -> vector<8x32xf32>
      %101 = vector.broadcast %1 : vector<1x32xf32> to vector<8x32xf32>
      %102 = arith.addf %100, %101 : vector<8x32xf32>
      %cst_43 = arith.constant 0.000000e+00 : f32
      %103 = vector.broadcast %cst_43 : f32 to vector<8x32xf32>
      %104 = arith.maximumf %102, %103 : vector<8x32xf32>
      %cst_44 = arith.constant dense<0.000000e+00> : vector<8x128xf32>
      %105 = tpu.matmul %104, %2, %cst_44 {dimension_numbers = #tpu.dot_dimension_numbers<[1], [0], [0], [1], [0, 0, 1, 1], [], []>} : vector<8x32xf32>, vector<32x128xf32>, vector<8x128xf32> -> vector<8x128xf32>
      %106 = vector.broadcast %3 : vector<1x128xf32> to vector<8x128xf32>
      %107 = arith.addf %105, %106 : vector<8x128xf32>
      %108 = math.tanh %107 : vector<8x128xf32>
      %109 = vector.extract_strided_slice %108 {offsets = [0, 0], sizes = [8, 32], strides = [1, 1]} : vector<8x128xf32> to vector<8x32xf32>
      %110 = vector.extract_strided_slice %99 {offsets = [0, 0], sizes = [8, 1], strides = [1, 1]} : vector<8x4xf32> to vector<8x1xf32>
      %111 = vector.broadcast %110 : vector<8x1xf32> to vector<8x32xf32>
      %112 = arith.mulf %109, %111 : vector<8x32xf32>
      %113 = vector.extract_strided_slice %108 {offsets = [0, 32], sizes = [8, 32], strides = [1, 1]} : vector<8x128xf32> to vector<8x32xf32>
      %114 = vector.extract_strided_slice %99 {offsets = [0, 1], sizes = [8, 1], strides = [1, 1]} : vector<8x4xf32> to vector<8x1xf32>
      %115 = vector.broadcast %114 : vector<8x1xf32> to vector<8x32xf32>
      %116 = arith.mulf %113, %115 : vector<8x32xf32>
      %117 = arith.addf %112, %116 : vector<8x32xf32>
      %118 = vector.extract_strided_slice %108 {offsets = [0, 64], sizes = [8, 32], strides = [1, 1]} : vector<8x128xf32> to vector<8x32xf32>
      %119 = vector.extract_strided_slice %99 {offsets = [0, 2], sizes = [8, 1], strides = [1, 1]} : vector<8x4xf32> to vector<8x1xf32>
      %120 = vector.broadcast %119 : vector<8x1xf32> to vector<8x32xf32>
      %121 = arith.mulf %118, %120 : vector<8x32xf32>
      %122 = arith.addf %117, %121 : vector<8x32xf32>
      %123 = vector.extract_strided_slice %108 {offsets = [0, 96], sizes = [8, 32], strides = [1, 1]} : vector<8x128xf32> to vector<8x32xf32>
      %124 = vector.extract_strided_slice %99 {offsets = [0, 3], sizes = [8, 1], strides = [1, 1]} : vector<8x4xf32> to vector<8x1xf32>
      %125 = vector.broadcast %124 : vector<8x1xf32> to vector<8x32xf32>
      %126 = arith.mulf %123, %125 : vector<8x32xf32>
      %127 = arith.addf %122, %126 : vector<8x32xf32>
      %c2_i32 = arith.constant 2 : i32
      %128 = arith.addi %27, %c2_i32 : i32
      %cst_45 = arith.constant 0.333333343 : f32
      %129 = vector.broadcast %cst_45 : f32 to vector<8x32xf32>
      %130 = arith.mulf %74, %129 : vector<8x32xf32>
      %131 = arith.subf %127, %130 : vector<8x32xf32>
      %132 = vector.broadcast %26 : f32 to vector<8x32xf32>
      %133 = arith.mulf %132, %131 : vector<8x32xf32>
      %134 = arith.addf %arg19, %133 : vector<8x32xf32>
      %135 = arith.index_cast %128 : i32 to index
      %136 = memref.load %arg1[%135] : memref<28xi32, #tpu.memory_space<smem>>
      %137 = arith.index_cast %128 : i32 to index
      %138 = memref.load %arg2[%137] : memref<28xf32, #tpu.memory_space<smem>>
      %139 = arith.index_cast %136 : i32 to index
      %c0_46 = arith.constant 0 : index
      %c0_47 = arith.constant 0 : index
      %140 = vector.load %arg5[%139, %c0_46, %c0_47] : memref<7x8x4xf32, #tpu.memory_space<vmem>>, vector<1x8x4xf32>
      %141 = vector.shape_cast %140 : vector<1x8x4xf32> to vector<8x4xf32>
      %142 = arith.index_cast %136 : i32 to index
      %c0_48 = arith.constant 0 : index
      %c0_49 = arith.constant 0 : index
      %143 = vector.load %arg6[%142, %c0_48, %c0_49] : memref<7x8x4xf32, #tpu.memory_space<vmem>>, vector<1x8x4xf32>
      %144 = vector.shape_cast %143 : vector<1x8x4xf32> to vector<8x4xf32>
      %145 = arith.index_cast %136 : i32 to index
      %c0_50 = arith.constant 0 : index
      %c0_51 = arith.constant 0 : index
      %146 = vector.load %arg7[%145, %c0_50, %c0_51] : memref<7x8x4xf32, #tpu.memory_space<vmem>>, vector<1x8x4xf32>
      %147 = vector.shape_cast %146 : vector<1x8x4xf32> to vector<8x4xf32>
      %148 = vector.broadcast %138 : f32 to vector<8x4xf32>
      %149 = arith.mulf %147, %148 : vector<8x4xf32>
      %150 = arith.addf %144, %149 : vector<8x4xf32>
      %151 = vector.broadcast %138 : f32 to vector<8x4xf32>
      %152 = arith.mulf %150, %151 : vector<8x4xf32>
      %153 = arith.addf %141, %152 : vector<8x4xf32>
      %cst_52 = arith.constant dense<0.000000e+00> : vector<8x32xf32>
      %154 = tpu.matmul %134, %0, %cst_52 {dimension_numbers = #tpu.dot_dimension_numbers<[1], [0], [0], [1], [0, 0, 1, 1], [], []>} : vector<8x32xf32>, vector<32x32xf32>, vector<8x32xf32> -> vector<8x32xf32>
      %155 = vector.broadcast %1 : vector<1x32xf32> to vector<8x32xf32>
      %156 = arith.addf %154, %155 : vector<8x32xf32>
      %cst_53 = arith.constant 0.000000e+00 : f32
      %157 = vector.broadcast %cst_53 : f32 to vector<8x32xf32>
      %158 = arith.maximumf %156, %157 : vector<8x32xf32>
      %cst_54 = arith.constant dense<0.000000e+00> : vector<8x128xf32>
      %159 = tpu.matmul %158, %2, %cst_54 {dimension_numbers = #tpu.dot_dimension_numbers<[1], [0], [0], [1], [0, 0, 1, 1], [], []>} : vector<8x32xf32>, vector<32x128xf32>, vector<8x128xf32> -> vector<8x128xf32>
      %160 = vector.broadcast %3 : vector<1x128xf32> to vector<8x128xf32>
      %161 = arith.addf %159, %160 : vector<8x128xf32>
      %162 = math.tanh %161 : vector<8x128xf32>
      %163 = vector.extract_strided_slice %162 {offsets = [0, 0], sizes = [8, 32], strides = [1, 1]} : vector<8x128xf32> to vector<8x32xf32>
      %164 = vector.extract_strided_slice %153 {offsets = [0, 0], sizes = [8, 1], strides = [1, 1]} : vector<8x4xf32> to vector<8x1xf32>
      %165 = vector.broadcast %164 : vector<8x1xf32> to vector<8x32xf32>
      %166 = arith.mulf %163, %165 : vector<8x32xf32>
      %167 = vector.extract_strided_slice %162 {offsets = [0, 32], sizes = [8, 32], strides = [1, 1]} : vector<8x128xf32> to vector<8x32xf32>
      %168 = vector.extract_strided_slice %153 {offsets = [0, 1], sizes = [8, 1], strides = [1, 1]} : vector<8x4xf32> to vector<8x1xf32>
      %169 = vector.broadcast %168 : vector<8x1xf32> to vector<8x32xf32>
      %170 = arith.mulf %167, %169 : vector<8x32xf32>
      %171 = arith.addf %166, %170 : vector<8x32xf32>
      %172 = vector.extract_strided_slice %162 {offsets = [0, 64], sizes = [8, 32], strides = [1, 1]} : vector<8x128xf32> to vector<8x32xf32>
      %173 = vector.extract_strided_slice %153 {offsets = [0, 2], sizes = [8, 1], strides = [1, 1]} : vector<8x4xf32> to vector<8x1xf32>
      %174 = vector.broadcast %173 : vector<8x1xf32> to vector<8x32xf32>
      %175 = arith.mulf %172, %174 : vector<8x32xf32>
      %176 = arith.addf %171, %175 : vector<8x32xf32>
      %177 = vector.extract_strided_slice %162 {offsets = [0, 96], sizes = [8, 32], strides = [1, 1]} : vector<8x128xf32> to vector<8x32xf32>
      %178 = vector.extract_strided_slice %153 {offsets = [0, 3], sizes = [8, 1], strides = [1, 1]} : vector<8x4xf32> to vector<8x1xf32>
      %179 = vector.broadcast %178 : vector<8x1xf32> to vector<8x32xf32>
      %180 = arith.mulf %177, %179 : vector<8x32xf32>
      %181 = arith.addf %176, %180 : vector<8x32xf32>
      %c3_i32 = arith.constant 3 : i32
      %182 = arith.addi %27, %c3_i32 : i32
      %183 = arith.subf %74, %127 : vector<8x32xf32>
      %184 = arith.addf %183, %181 : vector<8x32xf32>
      %185 = vector.broadcast %26 : f32 to vector<8x32xf32>
      %186 = arith.mulf %185, %184 : vector<8x32xf32>
      %187 = arith.addf %arg19, %186 : vector<8x32xf32>
      %188 = arith.index_cast %182 : i32 to index
      %189 = memref.load %arg1[%188] : memref<28xi32, #tpu.memory_space<smem>>
      %190 = arith.index_cast %182 : i32 to index
      %191 = memref.load %arg2[%190] : memref<28xf32, #tpu.memory_space<smem>>
      %192 = arith.index_cast %189 : i32 to index
      %c0_55 = arith.constant 0 : index
      %c0_56 = arith.constant 0 : index
      %193 = vector.load %arg5[%192, %c0_55, %c0_56] : memref<7x8x4xf32, #tpu.memory_space<vmem>>, vector<1x8x4xf32>
      %194 = vector.shape_cast %193 : vector<1x8x4xf32> to vector<8x4xf32>
      %195 = arith.index_cast %189 : i32 to index
      %c0_57 = arith.constant 0 : index
      %c0_58 = arith.constant 0 : index
      %196 = vector.load %arg6[%195, %c0_57, %c0_58] : memref<7x8x4xf32, #tpu.memory_space<vmem>>, vector<1x8x4xf32>
      %197 = vector.shape_cast %196 : vector<1x8x4xf32> to vector<8x4xf32>
      %198 = arith.index_cast %189 : i32 to index
      %c0_59 = arith.constant 0 : index
      %c0_60 = arith.constant 0 : index
      %199 = vector.load %arg7[%198, %c0_59, %c0_60] : memref<7x8x4xf32, #tpu.memory_space<vmem>>, vector<1x8x4xf32>
      %200 = vector.shape_cast %199 : vector<1x8x4xf32> to vector<8x4xf32>
      %201 = vector.broadcast %191 : f32 to vector<8x4xf32>
      %202 = arith.mulf %200, %201 : vector<8x4xf32>
      %203 = arith.addf %197, %202 : vector<8x4xf32>
      %204 = vector.broadcast %191 : f32 to vector<8x4xf32>
      %205 = arith.mulf %203, %204 : vector<8x4xf32>
      %206 = arith.addf %194, %205 : vector<8x4xf32>
      %cst_61 = arith.constant dense<0.000000e+00> : vector<8x32xf32>
      %207 = tpu.matmul %187, %0, %cst_61 {dimension_numbers = #tpu.dot_dimension_numbers<[1], [0], [0], [1], [0, 0, 1, 1], [], []>} : vector<8x32xf32>, vector<32x32xf32>, vector<8x32xf32> -> vector<8x32xf32>
      %208 = vector.broadcast %1 : vector<1x32xf32> to vector<8x32xf32>
      %209 = arith.addf %207, %208 : vector<8x32xf32>
      %cst_62 = arith.constant 0.000000e+00 : f32
      %210 = vector.broadcast %cst_62 : f32 to vector<8x32xf32>
      %211 = arith.maximumf %209, %210 : vector<8x32xf32>
      %cst_63 = arith.constant dense<0.000000e+00> : vector<8x128xf32>
      %212 = tpu.matmul %211, %2, %cst_63 {dimension_numbers = #tpu.dot_dimension_numbers<[1], [0], [0], [1], [0, 0, 1, 1], [], []>} : vector<8x32xf32>, vector<32x128xf32>, vector<8x128xf32> -> vector<8x128xf32>
      %213 = vector.broadcast %3 : vector<1x128xf32> to vector<8x128xf32>
      %214 = arith.addf %212, %213 : vector<8x128xf32>
      %215 = math.tanh %214 : vector<8x128xf32>
      %216 = vector.extract_strided_slice %215 {offsets = [0, 0], sizes = [8, 32], strides = [1, 1]} : vector<8x128xf32> to vector<8x32xf32>
      %217 = vector.extract_strided_slice %206 {offsets = [0, 0], sizes = [8, 1], strides = [1, 1]} : vector<8x4xf32> to vector<8x1xf32>
      %218 = vector.broadcast %217 : vector<8x1xf32> to vector<8x32xf32>
      %219 = arith.mulf %216, %218 : vector<8x32xf32>
      %220 = vector.extract_strided_slice %215 {offsets = [0, 32], sizes = [8, 32], strides = [1, 1]} : vector<8x128xf32> to vector<8x32xf32>
      %221 = vector.extract_strided_slice %206 {offsets = [0, 1], sizes = [8, 1], strides = [1, 1]} : vector<8x4xf32> to vector<8x1xf32>
      %222 = vector.broadcast %221 : vector<8x1xf32> to vector<8x32xf32>
      %223 = arith.mulf %220, %222 : vector<8x32xf32>
      %224 = arith.addf %219, %223 : vector<8x32xf32>
      %225 = vector.extract_strided_slice %215 {offsets = [0, 64], sizes = [8, 32], strides = [1, 1]} : vector<8x128xf32> to vector<8x32xf32>
      %226 = vector.extract_strided_slice %206 {offsets = [0, 2], sizes = [8, 1], strides = [1, 1]} : vector<8x4xf32> to vector<8x1xf32>
      %227 = vector.broadcast %226 : vector<8x1xf32> to vector<8x32xf32>
      %228 = arith.mulf %225, %227 : vector<8x32xf32>
      %229 = arith.addf %224, %228 : vector<8x32xf32>
      %230 = vector.extract_strided_slice %215 {offsets = [0, 96], sizes = [8, 32], strides = [1, 1]} : vector<8x128xf32> to vector<8x32xf32>
      %231 = vector.extract_strided_slice %206 {offsets = [0, 3], sizes = [8, 1], strides = [1, 1]} : vector<8x4xf32> to vector<8x1xf32>
      %232 = vector.broadcast %231 : vector<8x1xf32> to vector<8x32xf32>
      %233 = arith.mulf %230, %232 : vector<8x32xf32>
      %234 = arith.addf %229, %233 : vector<8x32xf32>
      %235 = arith.addf %127, %181 : vector<8x32xf32>
      %cst_64 = arith.constant 3.000000e+00 : f32
      %236 = vector.broadcast %cst_64 : f32 to vector<8x32xf32>
      %237 = arith.mulf %236, %235 : vector<8x32xf32>
      %238 = arith.addf %74, %237 : vector<8x32xf32>
      %239 = arith.addf %238, %234 : vector<8x32xf32>
      %240 = vector.broadcast %26 : f32 to vector<8x32xf32>
      %241 = arith.mulf %240, %239 : vector<8x32xf32>
      %cst_65 = arith.constant 1.250000e-01 : f32
      %242 = vector.broadcast %cst_65 : f32 to vector<8x32xf32>
      %243 = arith.mulf %241, %242 : vector<8x32xf32>
      %244 = arith.addf %arg19, %243 : vector<8x32xf32>
      %c1_i32_66 = arith.constant 1 : i32
      %245 = arith.addi %arg18, %c1_i32_66 : i32
      %246 = vector.broadcast %245 : i32 to vector<8x1xi32>
      %247 = arith.cmpi eq, %4, %246 : vector<8x1xi32>
      %248 = vector.shape_cast %247 : vector<8x1xi1> to vector<8x1xi1>
      %249 = vector.broadcast %248 : vector<8x1xi1> to vector<8x32xi1>
      %250 = arith.select %249, %244, %arg20 : vector<8x32xi1>, vector<8x32xf32>
      scf.yield %244, %250 : vector<8x32xf32>, vector<8x32xf32>
    }
    %c7_i32_17 = arith.constant 7 : i32
    %c0_18 = arith.constant 0 : index
    %c0_19 = arith.constant 0 : index
    %19 = vector.load %arg15[%c0_18, %c0_19] : memref<32x2xf32, #tpu.memory_space<vmem>>, vector<32x2xf32>
    %cst_20 = arith.constant dense<0.000000e+00> : vector<8x2xf32>
    %20 = tpu.matmul %18#1, %19, %cst_20 {dimension_numbers = #tpu.dot_dimension_numbers<[1], [0], [0], [1], [0, 0, 1, 1], [], []>} : vector<8x32xf32>, vector<32x2xf32>, vector<8x2xf32> -> vector<8x2xf32>
    %c0_21 = arith.constant 0 : index
    %c0_22 = arith.constant 0 : index
    %21 = vector.load %arg16[%c0_21, %c0_22] : memref<1x2xf32, #tpu.memory_space<vmem>>, vector<1x2xf32>
    %22 = vector.broadcast %21 : vector<1x2xf32> to vector<8x2xf32>
    %23 = arith.addf %20, %22 : vector<8x2xf32>
    %c0_23 = arith.constant 0 : index
    %c0_24 = arith.constant 0 : index
    %24 = vector.load %arg17[%c0_23, %c0_24] : memref<8x2xf32, #tpu.memory_space<vmem>>, vector<8x2xf32>
    tpu.vector_store %arg17[%c0_23, %c0_24], %23 {strides = array<i32>} : memref<8x2xf32, #tpu.memory_space<vmem>>, vector<8x2xf32>,
    return
  }
  func.func @transform_0(%arg0: i32) -> i32 {
    %c0_i32 = arith.constant 0 : i32
    %c0_i32_0 = arith.constant 0 : i32
    return %c0_i32 : i32
  }
  func.func @transform_1(%arg0: i32) -> i32 {
    %c0_i32 = arith.constant 0 : i32
    %c0_i32_0 = arith.constant 0 : i32
    return %c0_i32 : i32
  }
  func.func @transform_2(%arg0: i32) -> i32 {
    %c0_i32 = arith.constant 0 : i32
    %c0_i32_0 = arith.constant 0 : i32
    return %c0_i32 : i32
  }
  func.func @transform_3(%arg0: i32) -> (i32, i32) {
    %c0_i32 = arith.constant 0 : i32
    %c0_i32_0 = arith.constant 0 : i32
    return %arg0, %c0_i32 : i32, i32
  }
  func.func @transform_4(%arg0: i32) -> (i32, i32, i32) {
    %c0_i32 = arith.constant 0 : i32
    %c0_i32_0 = arith.constant 0 : i32
    %c0_i32_1 = arith.constant 0 : i32
    return %c0_i32, %arg0, %c0_i32_0 : i32, i32, i32
  }
  func.func @transform_5(%arg0: i32) -> (i32, i32, i32) {
    %c0_i32 = arith.constant 0 : i32
    %c0_i32_0 = arith.constant 0 : i32
    %c0_i32_1 = arith.constant 0 : i32
    return %c0_i32, %arg0, %c0_i32_0 : i32, i32, i32
  }
  func.func @transform_6(%arg0: i32) -> (i32, i32, i32) {
    %c0_i32 = arith.constant 0 : i32
    %c0_i32_0 = arith.constant 0 : i32
    %c0_i32_1 = arith.constant 0 : i32
    return %c0_i32, %arg0, %c0_i32_0 : i32, i32, i32
  }
  func.func @transform_7(%arg0: i32) -> (i32, i32) {
    %c0_i32 = arith.constant 0 : i32
    %c0_i32_0 = arith.constant 0 : i32
    return %arg0, %c0_i32 : i32, i32
  }
  func.func @transform_8(%arg0: i32) -> (i32, i32) {
    %c0_i32 = arith.constant 0 : i32
    %c0_i32_0 = arith.constant 0 : i32
    %c0_i32_1 = arith.constant 0 : i32
    return %c0_i32, %c0_i32_0 : i32, i32
  }
  func.func @transform_9(%arg0: i32) -> (i32, i32) {
    %c0_i32 = arith.constant 0 : i32
    %c0_i32_0 = arith.constant 0 : i32
    %c0_i32_1 = arith.constant 0 : i32
    return %c0_i32, %c0_i32_0 : i32, i32
  }
  func.func @transform_10(%arg0: i32) -> (i32, i32) {
    %c0_i32 = arith.constant 0 : i32
    %c0_i32_0 = arith.constant 0 : i32
    %c0_i32_1 = arith.constant 0 : i32
    return %c0_i32, %c0_i32_0 : i32, i32
  }
  func.func @transform_11(%arg0: i32) -> (i32, i32) {
    %c0_i32 = arith.constant 0 : i32
    %c0_i32_0 = arith.constant 0 : i32
    %c0_i32_1 = arith.constant 0 : i32
    return %c0_i32, %c0_i32_0 : i32, i32
  }
  func.func @transform_12(%arg0: i32) -> (i32, i32) {
    %c0_i32 = arith.constant 0 : i32
    %c0_i32_0 = arith.constant 0 : i32
    %c0_i32_1 = arith.constant 0 : i32
    return %c0_i32, %c0_i32_0 : i32, i32
  }
  func.func @transform_13(%arg0: i32) -> (i32, i32) {
    %c0_i32 = arith.constant 0 : i32
    %c0_i32_0 = arith.constant 0 : i32
    %c0_i32_1 = arith.constant 0 : i32
    return %c0_i32, %c0_i32_0 : i32, i32
  }
  func.func @transform_14(%arg0: i32) -> (i32, i32) {
    %c0_i32 = arith.constant 0 : i32
    %c0_i32_0 = arith.constant 0 : i32
    %c0_i32_1 = arith.constant 0 : i32
    return %c0_i32, %c0_i32_0 : i32, i32
  }
  func.func @transform_15(%arg0: i32) -> (i32, i32) {
    %c0_i32 = arith.constant 0 : i32
    %c0_i32_0 = arith.constant 0 : i32
    %c0_i32_1 = arith.constant 0 : i32
    return %c0_i32, %c0_i32_0 : i32, i32
  }
  func.func @transform_16(%arg0: i32) -> (i32, i32) {
    %c0_i32 = arith.constant 0 : i32
    %c0_i32_0 = arith.constant 0 : i32
    return %arg0, %c0_i32 : i32, i32
  }
}

</mosaic_0001>

<bundles_post_ra>
// kernel: tpu_custom_call.1
= control target key start
LH: loop header
LB: loop body
LE: loop exit
PB: predicated region body
PF: predicated region fallthrough
CT: control target
= control target key end

     0   :  { %s3012_s0 = inlined_call_operand.vmem [shape: s32[28], index: 0, kind: input, shape index: {}]   ;;  %s3013_s1 = inlined_call_operand.vmem [shape: f32[28], index: 1, kind: input, shape index: {}]   ;;  %s3014_s2 = inlined_call_operand.vmem [shape: f32[7], index: 2, kind: input, shape index: {}]   ;;  %s3015_s3 = inlined_call_operand.vmem [shape: s32[16,1], index: 3, kind: input, shape index: {}]   ;;  %s3016_s4 = inlined_call_operand.vmem [shape: f32[7,16,4], index: 4, kind: input, shape index: {}]   ;;  %s3017_s5 = inlined_call_operand.vmem [shape: f32[7,16,4], index: 5, kind: input, shape index: {}]   ;;  %s3018_s6 = inlined_call_operand.vmem [shape: f32[7,16,4], index: 6, kind: input, shape index: {}]   ;;  %s3019_s7 = inlined_call_operand.vmem [shape: f32[16,4], index: 7, kind: input, shape index: {}]   ;;  %s3020_s8 = inlined_call_operand.vmem [shape: f32[4,32], index: 8, kind: input, shape index: {}]   ;;  %s3021_s9 = inlined_call_operand.vmem [shape: f32[1,32], index: 9, kind: input, shape index: {}]   ;;  %s3022_s10 = inlined_call_operand.vmem [shape: f32[32,32], index: 10, kind: input, shape index: {}]   ;;  %s3023_s11 = inlined_call_operand.vmem [shape: f32[1,32], index: 11, kind: input, shape index: {}]   ;;  %s3024_s12 = inlined_call_operand.vmem [shape: f32[32,128], index: 12, kind: input, shape index: {}]   ;;  %s3025_s13 = inlined_call_operand.vmem [shape: f32[1,128], index: 13, kind: input, shape index: {}]   ;;  %s3026_s14 = inlined_call_operand.vmem [shape: f32[32,2], index: 14, kind: input, shape index: {}]   ;;  %s3027_s15 = inlined_call_operand.vmem [shape: f32[1,2], index: 15, kind: input, shape index: {}]   ;;  %s3028_s16 = inlined_call_operand.vmem [shape: f32[16,2], index: 16, kind: output, shape index: {}]  }
   0x1   :  { %3037 = sst [smem:[#allocation14_spill]] %s3012_s0 }
   0x2   :  { %3038 = sst [smem:[#allocation15_spill]] %s3027_s15 }
   0x3   :  { %21 = vsyncpa [#allocation3], 0 }
   0x4   :  { %22 = vsyncpa [#allocation5], 0  ;;  %s2599_s21 = smov 0   ;;  %s2601_s22 = smov 0  }
   0x5   :  { %s2603_s23 = smov 0  }
   0x6 LB: > { %s2615_s24 = sadd.s32 4294967295, %s2483_s23   ;;  %s2618_s25 = sadd.s32 1, %s2483_s23   ;;  %s2483_s23 = sphi %s2603_s23, %s3058_s23   ;;  %s2479_s22 = sphi %s2601_s22, %s3061_s22   ;;  %s2475_s21 = sphi %s2599_s21, %s3060_s21  }
   0x7   : > { %3039 = sst [smem:[#allocation12_spill]] %s2618_s25  ;;  %s121_s26 = ssub.s32 %s2483_s23, %s2618_s25 }
   0x8   : > { %s124_s27 = sadd.s32 1, %s2479_s22  ;;  %p122_p0 = scmp.eq.s32.totalorder %s121_s26, 0 }
   0x9   : > { %p131_p1 = scmp.ne.s32.totalorder %s2479_s22, %s2475_s21  ;;  %p132_p2 = scmp.eq.s32.totalorder %s2483_s23, 0 }
   0xa   : > { %p2032_p3 = scmp.ge.s32.totalorder %s2483_s23, 1  ;;  %p420_p5 = scmp.lt.s32.totalorder %s2483_s23, 3 }
   0xb   : > { %s2628_s28 = scalar_select %p122_p0, %s2479_s22, %s124_s27  }
   0xc   : > { %p2630_p4 = por %p132_p2, %p131_p1  ;;  %p3031_p6 = scmp.eq.s32.totalorder %s2615_s24, 0 }
   0xd   : > { %3040 = sst [smem:[#allocation13_spill]] %s2628_s28  ;;  %p2636_p7 = pnand %p2032_p3, %p420_p5 }
   0xe   : > { %s3041_s29 = scalar_select %p2630_p4, 1, 0 }
   0xf   : > { %s3042_s30 = scalar_select %p2636_p7, 1, 0 }
  0x10   : > { %s444_s18 = sshll.u32 %s3013_s1, 4  ;;  %p2290_p8 = pneg %p2636_p7  ;;  %s445_s18 = int_to_ptr.vmem [resolvable:$true] %s444_s18 }
  0x11   : > { %s3043_s26 = sld [smem:[#allocation14_spill]]  ;;  %s455_s0 = sshll.u32 %s3014_s2, 4  ;;  %s2657_s0 = int_to_ptr.vmem [resolvable:$true] %s455_s0 }
  0x12   : > { %p2650_p9 = pnand %p3031_p6, %p2290_p8  ;;  %s2396_s17 = scalar_lea.vmem %s445_s18, 16 }
  0x13   : > { %p2397_p10 = scmp.ne.s32.totalorder %s445_s18, %s2396_s17  ;;  %p2404_p0 = scmp.lt.s32.totalorder %s445_s18, %s445_s18 }
  0x14   : > { %p2398_p11 = pneg %p2650_p9  ;;  %p2405_p1 = scmp.lt.s32.totalorder %s2396_s17, %s2396_s17 }
  0x16   : > { %p2399_p12 = pnand %p2398_p11, %p2397_p10  ;;  %p2406_p2 = por %p2405_p1, %p2404_p0 }
  0x17   : > { %s433_s27 = sshll.u32 %s3043_s26, 4  ;;  %s434_s27 = int_to_ptr.vmem [resolvable:$true] %s433_s27 }
  0x18   : > { %p2400_p13 = pneg %p2399_p12 }
  0x1a   : > { %p2407_p3 = pnand %p2406_p2, %p2400_p13 }
  0x1c   : > { %2410 = shalt.err (!%p2407_p3)
}
  0x1d   : > { %s2497_s19 = smov [#allocation4]   ;;  %s2411_s15 = scalar_lea.vmem %s434_s27, 16 }
  0x1e   : > { %2296 = dma.vmem_to_smem (!%p2650_p9), %s445_s18, 16, %s2497_s19, [#allocation5]  }
  0x1f   : > { %p2412_p5 = scmp.ne.s32.totalorder %s434_s27, %s2411_s15  ;;  %p2419_p7 = scmp.lt.s32.totalorder %s434_s27, %s434_s27 }
  0x20   : > { %p2420_p4 = scmp.lt.s32.totalorder %s2411_s15, %s2411_s15 }
  0x21   : > { %p2414_p8 = pnand %p2412_p5, %p2398_p11 }
  0x22   : > { %p2421_p10 = por %p2420_p4, %p2419_p7 }
  0x23   : > { %p2415_p6 = pneg %p2414_p8 }
  0x25   : > { %p2422_p12 = pnand %p2421_p10, %p2415_p6 }
  0x27   : > { %2425 = shalt.err (!%p2422_p12)
}
  0x28   : > { %s2498_s25 = smov [#allocation2]   ;;  %s2426_s18 = scalar_lea.vmem %s2657_s0, 16 }
  0x29   : > { %2293 = dma.vmem_to_smem (!%p2650_p9), %s434_s27, 16, %s2498_s25, [#allocation3]  }
  0x2a   : > { %p2427_p13 = scmp.ne.s32.totalorder %s2657_s0, %s2426_s18  ;;  %p2434_p2 = scmp.lt.s32.totalorder %s2657_s0, %s2657_s0 }
  0x2b   : > { %p2435_p3 = scmp.lt.s32.totalorder %s2426_s18, %s2426_s18 }
  0x2c   : > { %p2429_p0 = pnand %p2427_p13, %p2398_p11 }
  0x2d   : > { %p2436_p4 = por %p2435_p3, %p2434_p2 }
  0x2e   : > { %p2430_p1 = pneg %p2429_p0 }
  0x30   : > { %p2437_p6 = pnand %p2436_p4, %p2430_p1 }
  0x32   : > { %2440 = shalt.err (!%p2437_p6)
}
  0x33   : > { %s2499_s20 = smov [#allocation6]   ;;  %p2036_p7 = scmp.ge.s32.totalorder %s2483_s23, 2 }
  0x34   : > { %2299 = dma.vmem_to_smem (!%p2650_p9), %s2657_s0, 16, %s2499_s20, [#allocation5]  }
  0x35   : > { %486 = sbr.rel (%p2036_p7) target bundleno = 88 (0x58), region = 60  ;;  %p3045_p5 = scmp.ne.s32.totalorder (!%p2036_p7), %s3041_s29, 0 }
  0x3c   : > { %496 = sbr.rel (!%p3045_p5) target bundleno = 68 (0x44), region = 68  ;;  %s498_s26 = sand.u32 (%p3045_p5), 1, %s2479_s22  }
  0x3d   : > { %s2037_s27 = sshll.u32 (%p3045_p5), %s2483_s23, 3  ;;  %s2274_s17 = smul.u32 (%p3045_p5), 56, %s498_s26 }
  0x3e   : > { %s502_s25 = scalar_lea.vmem (%p3045_p5), %s3016_s4, %s2037_s27 }
  0x3f   : > { %v542_v0 = vld [vmem:[%s502_s25] sm:$0xff] (%p3045_p5)  ;;  %v544_v1 = vld [vmem:[%s502_s25 + $0x10] sm:$0xff] (%p3045_p5)  ;;  %s500_s28 = scalar_lea.vmem (%p3045_p5), [#allocation7], %s2274_s17 }
  0x40   : > { %v546_v2 = vld [vmem:[%s502_s25 + $0x20] sm:$0xff] (%p3045_p5)  ;;  %v548_v3 = vld [vmem:[%s502_s25 + $0x30] sm:$0xff] (%p3045_p5)  ;;  %543 = vst [vmem:[%s500_s28] sm:$0xff] (%p3045_p5), %v542_v0  ;;  %545 = vst [vmem:[%s500_s28 + $0x8] sm:$0xff] (%p3045_p5), %v544_v1 }
  0x41   : > { %v550_v4 = vld [vmem:[%s502_s25 + $0x40] sm:$0xff] (%p3045_p5)  ;;  %v552_v5 = vld [vmem:[%s502_s25 + $0x50] sm:$0xff] (%p3045_p5)  ;;  %547 = vst [vmem:[%s500_s28 + $0x10] sm:$0xff] (%p3045_p5), %v546_v2  ;;  %549 = vst [vmem:[%s500_s28 + $0x18] sm:$0xff] (%p3045_p5), %v548_v3 }
  0x42   : > { %551 = vst [vmem:[%s500_s28 + $0x20] sm:$0xff] (%p3045_p5), %v550_v4  ;;  %553 = vst [vmem:[%s500_s28 + $0x28] sm:$0xff] (%p3045_p5), %v552_v5  ;;  %v554_v6 = vld [vmem:[%s502_s25 + $0x60] sm:$0xff] (%p3045_p5) }
  0x43   : > { %555 = vst [vmem:[%s500_s28 + $0x30] sm:$0xff] %v554_v6 }
  0x44 PF: > { %p3046_p9 = scmp.ne.s32.totalorder %s3041_s29, 0 }
  0x45   : > { %s563_s0 = sand.u32 (%p3046_p9), 1, %s2479_s22   ;;  %s2038_s18 = sshll.u32 (%p3046_p9), %s2483_s23, 3 }
  0x46   : > { %561 = sbr.rel (!%p3046_p9) target bundleno = 78 (0x4e), region = 106  ;;  %s567_s17 = scalar_lea.vmem (%p3046_p9), %s3017_s5, %s2038_s18 }
  0x47   : > { %s2275_s20 = smul.u32 (%p3046_p9), 56, %s563_s0  ;;  %v607_v7 = vld [vmem:[%s567_s17] sm:$0xff] (%p3046_p9)  ;;  %v609_v8 = vld [vmem:[%s567_s17 + $0x10] sm:$0xff] (%p3046_p9) }
  0x48   : > { %v611_v9 = vld [vmem:[%s567_s17 + $0x20] sm:$0xff] (%p3046_p9)  ;;  %v613_v10 = vld [vmem:[%s567_s17 + $0x30] sm:$0xff] (%p3046_p9) }
  0x49   : > { %v615_v11 = vld [vmem:[%s567_s17 + $0x40] sm:$0xff] (%p3046_p9)  ;;  %v617_v12 = vld [vmem:[%s567_s17 + $0x50] sm:$0xff] (%p3046_p9)  ;;  %s565_s19 = scalar_lea.vmem (%p3046_p9), [#allocation8], %s2275_s20 }
  0x4a   : > { %608 = vst [vmem:[%s565_s19] sm:$0xff] (%p3046_p9), %v607_v7  ;;  %610 = vst [vmem:[%s565_s19 + $0x8] sm:$0xff] (%p3046_p9), %v609_v8  ;;  %v619_v13 = vld [vmem:[%s567_s17 + $0x60] sm:$0xff] (%p3046_p9) }
  0x4b   : > { %612 = vst [vmem:[%s565_s19 + $0x10] sm:$0xff] (%p3046_p9), %v611_v9  ;;  %614 = vst [vmem:[%s565_s19 + $0x18] sm:$0xff] (%p3046_p9), %v613_v10 }
  0x4c   : > { %616 = vst [vmem:[%s565_s19 + $0x20] sm:$0xff] (%p3046_p9), %v615_v11  ;;  %618 = vst [vmem:[%s565_s19 + $0x28] sm:$0xff] (%p3046_p9), %v617_v12 }
  0x4d   : > { %620 = vst [vmem:[%s565_s19 + $0x30] sm:$0xff] %v619_v13 }
  0x4e PF: > { %p3047_p11 = scmp.ne.s32.totalorder %s3041_s29, 0 }
  0x4f   : > { %s628_s15 = sand.u32 (%p3047_p11), 1, %s2479_s22   ;;  %s2039_s25 = sshll.u32 (%p3047_p11), %s2483_s23, 3 }
  0x50   : > { %626 = sbr.rel (!%p3047_p11) target bundleno = 88 (0x58), region = 144  ;;  %s632_s20 = scalar_lea.vmem (%p3047_p11), %s3018_s6, %s2039_s25 }
  0x51   : > { %s2276_s28 = smul.u32 (%p3047_p11), 56, %s628_s15  ;;  %v672_v14 = vld [vmem:[%s632_s20] sm:$0xff] (%p3047_p11)  ;;  %v674_v15 = vld [vmem:[%s632_s20 + $0x10] sm:$0xff] (%p3047_p11) }
  0x52   : > { %v676_v16 = vld [vmem:[%s632_s20 + $0x20] sm:$0xff] (%p3047_p11)  ;;  %v678_v17 = vld [vmem:[%s632_s20 + $0x30] sm:$0xff] (%p3047_p11) }
  0x53   : > { %v680_v18 = vld [vmem:[%s632_s20 + $0x40] sm:$0xff] (%p3047_p11)  ;;  %v682_v19 = vld [vmem:[%s632_s20 + $0x50] sm:$0xff] (%p3047_p11)  ;;  %s630_s26 = scalar_lea.vmem (%p3047_p11), [#allocation9], %s2276_s28 }
  0x54   : > { %673 = vst [vmem:[%s630_s26] sm:$0xff] (%p3047_p11), %v672_v14  ;;  %675 = vst [vmem:[%s630_s26 + $0x8] sm:$0xff] (%p3047_p11), %v674_v15  ;;  %v684_v20 = vld [vmem:[%s632_s20 + $0x60] sm:$0xff] (%p3047_p11) }
  0x55   : > { %677 = vst [vmem:[%s630_s26 + $0x10] sm:$0xff] (%p3047_p11), %v676_v16  ;;  %679 = vst [vmem:[%s630_s26 + $0x18] sm:$0xff] (%p3047_p11), %v678_v17 }
  0x56   : > { %681 = vst [vmem:[%s630_s26 + $0x20] sm:$0xff] (%p3047_p11), %v680_v18  ;;  %683 = vst [vmem:[%s630_s26 + $0x28] sm:$0xff] (%p3047_p11), %v682_v19 }
  0x57   : > { %685 = vst [vmem:[%s630_s26 + $0x30] sm:$0xff] %v684_v20 }
  0x58 PF: > { %p3048_p8 = scmp.ne.s32.totalorder %s3042_s30, 0 }
  0x59   : > { %p3049_p10 = scmp.eq.s32.totalorder (!%p3048_p8), %s2615_s24, 0 }
  0x5a   : > { %701 = sbr.rel (%p3048_p8) target bundleno = 2854 (0xb26), region = 186 }
  0x61   : > { %2466 = dma.done.wait (%p3049_p10), [#allocation3], 16   ;;  %p3050_p12 = pmov %p3049_p10 }
  0x62   : > { %p3051_p13 = pmov %p3049_p10 }
  0x63   : > { %2468 = vsyncadd (%p3050_p12), [#allocation3], 4294967280 }
  0x64   : > { %2470 = dma.done.wait (%p3051_p13), [#allocation5], 32   ;;  %p3052_p0 = pmov %p3049_p10 }
  0x65   : > { %s716_s23 = sand.u32 1, %s2475_s21  }
  0x66   : > { %2472 = vsyncadd (%p3052_p0), [#allocation5], 4294967264  ;;  %s2277_s29 = smul.u32 56, %s716_s23 }
  0x68   : > { %s2714_s27 = scalar_lea.vmem [#allocation7], %s2277_s29  ;;  %s2716_s17 = scalar_lea.vmem [#allocation8], %s2277_s29 }
  0x69   : > { %s2718_s30 = scalar_lea.vmem [#allocation9], %s2277_s29 }
  0x6a   : > { %736 = sfence }
  0x6b   : > { %v2723_v21 = vld [vmem:[%s3022_s10] sm:$0xff]  ;;  %v2728_v22 = vld [vmem:[%s3022_s10 + $0x8] sm:$0xff]  ;;  %v2733_v23 = vld [vmem:[%s3022_s10 + $0x10] sm:$0xff]  ;;  %v2500_v27 = vmov 0.0   ;;  %vm831_vm0 = vcmask 1043456   ;;  %vm2501_vm1 = vmmov 0  }
  0x6c   : > { %v2738_v24 = vld [vmem:[%s3022_s10 + $0x18] sm:$0xff]  ;;  %v2743_v25 = vld [vmem:[%s3023_s11] ss:$0 sm:$0xff]  ;;  %2116 = vmatprep.subr.mxu0 %v2500_v27  ;;  %2118 = vmatprep.mubr.msk.f32.mxu0 %vm2501_vm1, %v2500_v27  ;;  %p795_p1 = scmp.lt.s32.totalorder %s2615_s24, 1  ;;  %v2757_v28 = vld [vmem:[%s3024_s12 + $0x8] sm:$0xff]  ;;  %v2502_v33 = vmov 0  }
  0x6d   : > { %v2748_v26 = vld [vmem:[%s3024_s12] sm:$0xff]  ;;  %v2762_v29 = vld [vmem:[%s3024_s12 + $0x10] sm:$0xff]  ;;  %v2767_v30 = vld [vmem:[%s3024_s12 + $0x18] sm:$0xff]  ;;  %2371 = vset.pattern.permute.xlu0 %v2502_v33  ;;  %vm827_vm2 = vcmask 31744   ;;  %s2802_s15 = smov 0  }
  0x6e   : > { %v2772_v31 = vld [vmem:[%s3025_s13] ss:$0 sm:$0xff]  ;;  %s3063_s24 = smov (!%p795_p1, %s2615_s24), 1 }
  0x6f   : > { %v819_v32 = vld [vmem:[%s3020_s8] sm:$0xf]  ;;  %s2778_s19 = sshll.u32 %s3063_s24, 3 }
  0x70   : > { %2117 = vmatpush3.msk.msra.mxu0 %vm831_vm0, %v819_v32  ;;  %s802_s28 = scalar_lea.vmem %s3019_s7, %s2778_s19  ;;  %s798_s23 = scalar_lea.vmem %s3015_s3, %s2778_s19  ;;  %v2047_v38 = vld [vmem:[%s3021_s9] ss:$0 sm:$0xff] }
  0x71   : > { %v818_v34 = vld [vmem:[%s802_s28] sm:$0xff] }
  0x72   : > { %2119 = vmatmul.mubr.msk.f32.vlgmr.msra.gmra.mrb[0].mxu0 %vm827_vm2, %v818_v34  ;;  %v2792_v35 = vld [vmem:[%s798_s23] sm:$0xff] }
  0x73   : > { %vm905_vm3 = vcmp.eq.s32.totalorder %v2792_v35, 0 }
  0x74   : > { %v906_v36 = vsel %vm905_vm3, 1, %v2502_v33 }
  0x75   : > { %908 = vperm.xlu0 %2371, %v906_v36  }
  0xf4   : > { %v909_v37 = vpop.permute.xlu0 %908 }
  0xf5   : > { %vm910_vm4 = vcmp.eq.s32.totalorder %v909_v37, 1 }
 0x145   : > { %v901_v39 = vpop.f32.mrb[0].mxu0 }
 0x146   : > { %v902_v40 = vadd.f32 %v2047_v38, %v901_v39   ;;  %v2120_v41 = vpop.f32.mrb[1].mxu0 }
 0x148   : > { %v911_v42 = vsel %vm910_vm4, %v902_v40, 0.0  }
 0x149 LB: >> { %v2815_v43 = vpack.c.bf16 %v2728_v22, %v2723_v21  ;;  %v2503_v44 = vmov 0.0|0.0   ;;  %v2821_v45 = vpack.c.bf16 %v2757_v28, %v2748_v26  ;;  %v2826_v46 = vpack.c.bf16 %v2738_v24, %v2733_v23  ;;  %s2854_s25 = sshll.u32 %s2495_s15, 2  ;;  %s3033_s24 = smov 64   ;;  %s2495_s15 = sphi %s2802_s15, %s2958_s15   ;;  %v2491_v40 = vphi %v902_v40, %v1748_v40   ;;  %v2487_v42 = vphi %v911_v42, %v3055_v42  }
 0x14a   : >> { %2220 = vmatprep.subr.bf16.mxu0 %v2503_v44  ;;  %2226 = vmatprep.subr.bf16.mxu1 %v2503_v44  ;;  %vm2504_vm5 = vmmov 0   ;;  %v2505_v47 = vmov 0.0   ;;  %vm942_vm6 = vcmask 261120   ;;  %v2847_v48 = vpack.c.bf16 %v2767_v30, %v2762_v29  ;;  %s922_s28 = sld [smem:[#allocation2 + %s2854_s25]]  ;;  %s2511_s29 = smov 96  }
 0x14b   : >> { %2222 = vmatpush3.bf16.msra.mxu0 %v2815_v43  ;;  %2129 = vmatprep.mubr.msk.f32.mxu0 %vm2504_vm5, %v2505_v47  ;;  %v2506_v49 = vmov 3   ;;  %v2507_v50 = vmov 1   ;;  %s923_s21 = sld [smem:[#allocation4 + %s2854_s25]]  ;;  %v2508_v59 = vmov 0   ;;  %v2509_v60 = vmov 2  }
 0x14c   : >> { %2223 = vmatprep.subr.bf16.mxu0 %v2503_v44  ;;  %2228 = vmatpush3.bf16.msra.mxu1 %v2821_v45 }
 0x14d   : >> { %2229 = vmatprep.subr.bf16.mxu1 %v2503_v44  ;;  %2140 = vmatprep.mubr.msk.f32.mxu1 %vm2504_vm5, %v2505_v47 }
 0x14e   : >> { %2374 = vset.pattern.permute.xlu1 %v2506_v49  ;;  %2372 = vset.pattern.permute.xlu0 %v2507_v50 }
 0x14f   : >> { %2225 = vmatpush3.bf16.msra.mxu0 %v2826_v46 }
 0x150   : >> { %2232 = vmatprep.subr.bf16.mxu0 %v2503_v44  ;;  %2231 = vmatpush3.bf16.msra.mxu1 %v2847_v48  ;;  %s2051_s0 = sshll.u32 %s922_s28, 3  ;;  %s3035_s28 = smov 32  }
 0x151   : >> { %2238 = vmatprep.subr.bf16.mxu1 %v2503_v44  ;;  %s927_s20 = scalar_lea.vmem %s2716_s17, %s2051_s0 [#allocation8]  ;;  %v931_v51 = vstv %s923_s21  ;;  %s929_s26 = scalar_lea.vmem %s2718_s30, %s2051_s0 [#allocation9] }
 0x152   : >> { %2130 = vmatmul.mubr.msk.f32.vlgmr.msra.gmra.mrb[0].mxu0 %vm942_vm6, %v2491_v40  ;;  %v928_v52 = vld [vmem:[%s927_s20] sm:$0xff]  ;;  %s925_s23 = scalar_lea.vmem %s2714_s27, %s2051_s0 [#allocation7]  ;;  %s920_s21 = sld [smem:[#allocation6 + %s2495_s15]] }
 0x153   : >> { %2234 = vmatpush3.bf16.msra.mxu0 %v2815_v43  ;;  %2151 = vmatprep.mubr.msk.f32.mxu0 %vm2504_vm5, %v2505_v47  ;;  %v930_v53 = vld [vmem:[%s929_s26] sm:$0xff]  ;;  %s1133_s0 = sadd.s32 1, %s2854_s25  ;;  %s2958_s15 = sadd.s32 1, %s2495_s15  }
 0x154   : >> { %2235 = vmatprep.subr.bf16.mxu0 %v2503_v44  ;;  %v932_v54 = vmul.f32 %v931_v51, %v930_v53  ;;  %v926_v56 = vld [vmem:[%s925_s23] sm:$0xff]  ;;  %s1138_s20 = sld [smem:[#allocation2 + %s1133_s0]]  ;;  %p914_p2 = scmp.ge.s32.totalorder %s2958_s15, 7  }
 0x155   : >> { %s1139_s26 = sld [smem:[#allocation4 + %s1133_s0]]  ;;  %v1761_v21 = vld [vmem:[%s3026_s14 + $0x18] sm:$0xff] (%p914_p2)  ;;  %vm1843_vm9 = vcmask (%p914_p2), 15360  }
 0x156   : >> { %v933_v55 = vadd.f32 %v932_v54, %v928_v52 }
 0x157   : >> { %2237 = vmatpush3.bf16.msra.mxu0 %v2826_v46 }
 0x158   : >> { %2244 = vmatprep.subr.bf16.mxu0 %v2503_v44  ;;  %v934_v57 = vmul.f32 %v933_v55, %v931_v51  ;;  %v2878_v17 = vstv %s920_s21 }
 0x15a   : >> { %v935_v58 = vadd.f32 %v934_v57, %v926_v56  ;;  %s2056_s23 = sshll.u32 %s1138_s20, 3 }
 0x15b   : >> { %s1143_s21 = scalar_lea.vmem %s2716_s17, %s2056_s23 [#allocation8]  ;;  %v1147_v34 = vstv %s1139_s26  ;;  %s1145_s18 = scalar_lea.vmem %s2718_s30, %s2056_s23 [#allocation9] }
 0x15c   : >> { %1124 = vperm.xlu1 %2374, %v935_v58   ;;  %1104 = vperm.xlu0 %2372, %v935_v58   ;;  %v1144_v36 = vld [vmem:[%s1143_s21] sm:$0xff] }
 0x15d   : >> { %v1146_v37 = vld [vmem:[%s1145_s18] sm:$0xff]  ;;  %s3053_s18 = smov 64  }
 0x15e   : >> { %v1148_v38 = vmul.f32 %v1147_v34, %v1146_v37 }
 0x160   : >> { %2375 = vset.pattern.permute.xlu1 %v2508_v59  ;;  %2373 = vset.pattern.permute.xlu0 %v2509_v60  ;;  %v1149_v39 = vadd.f32 %v1148_v38, %v1144_v36 }
 0x161   : >> { %1099 = vperm.xlu1 %2375, %v935_v58   ;;  %1114 = vperm.xlu0 %2373, %v935_v58  }
 0x162   : >> { %v1150_v51 = vmul.f32 %v1149_v39, %v1147_v34 }
 0x165   : >> { %2377 = vset.pattern.permute.xlu1 %v2509_v60  ;;  %2376 = vset.pattern.permute.xlu0 %v2507_v50 }
 0x1db   : >> { %v1105_v4 = vpop.permute.xlu0 %1104  ;;  %v1125_v9 = vpop.permute.xlu1 %1124 }
 0x1e0   : >> { %v1115_v5 = vpop.permute.xlu0 %1114  ;;  %v1100_v11 = vpop.permute.xlu1 %1099 }
 0x225   : >> { %v1012_v61 = vpop.f32.mrb[0].mxu0 }
 0x226   : >> { %v1013_v62 = vadd.f32 %v2743_v25, %v1012_v61  ;;  %v2131_v63 = vpop.f32.mrb[1].mxu0 }
 0x228   : >> { %v1016_v0 = vmax.f32 %v1013_v62, 0.0 }
 0x22a   : >> { %2141 = vmatmul.mubr.msk.f32.vlgmr.msra.gmra.mrb[0].mxu1 %vm942_vm6, %v1016_v0 }
 0x22b   : >> { %2240 = vmatpush3.bf16.msra.mxu1 %v2821_v45  ;;  %2162 = vmatprep.mubr.msk.f32.mxu1 %vm2504_vm5, %v2505_v47 }
 0x22c   : >> { %2241 = vmatprep.subr.bf16.mxu1 %v2503_v44 }
 0x22f   : >> { %2243 = vmatpush3.bf16.msra.mxu1 %v2847_v48 }
 0x230   : >> { %2250 = vmatprep.subr.bf16.mxu1 %v2503_v44 }
 0x2fd   : >> { %v1092_v1 = vpop.f32.mrb[0].mxu1 }
 0x2fe   : >> { %v1093_v2 = vadd.f32 %v2772_v31, %v1092_v1  ;;  %v2142_v3 = vpop.f32.mrb[1].mxu1 }
 0x300   : >> { %2388 = vtanh.f32 %v1093_v2 }
 0x30a   : >> { %v2389_v6 = vpop.eup %2388 }
 0x30b   : >> { %v1107_v7 = vmul.f32 %v2389_v6, %v1105_v4  ;;  %v1117_v8 = vmul.f32 %v2389_v6, %v1115_v5  ;;  %v1127_v10 = vmul.f32 %v2389_v6, %v1125_v9  ;;  %v1102_v12 = vmul.f32 %v2389_v6, %v1100_v11 }
 0x30d   : >> { %1119 = vrot.lane.b32.xlu0 %v1117_v8, %s3033_s24  ;;  %1109 = vrot.lane.b32.xlu1 %v1107_v7, %s2511_s29  ;;  %s1141_s24 = scalar_lea.vmem %s2714_s27, %s2056_s23 [#allocation7] }
 0x30e   : >> { %v1142_v41 = vld [vmem:[%s1141_s24] sm:$0xff]  ;;  %s1336_s24 = sadd.s32 2, %s2854_s25 }
 0x30f   : >> { %v1151_v52 = vadd.f32 %v1150_v51, %v1142_v41  ;;  %s1341_s0 = sld [smem:[#allocation2 + %s1336_s24]] }
 0x310   : >> { %s1342_s20 = sld [smem:[#allocation4 + %s1336_s24]] }
 0x311   : >> { %1129 = vrot.lane.b32.xlu1 %v1127_v10, %s3035_s28  ;;  %1307 = vperm.xlu0 %2376, %v1151_v52  }
 0x315   : >> { %1317 = vperm.xlu1 %2377, %v1151_v52   ;;  %2379 = vset.pattern.permute.xlu0 %v2508_v59  ;;  %s2059_s26 = sshll.u32 %s1341_s0, 3 }
 0x316   : >> { %1302 = vperm.xlu0 %2379, %v1151_v52   ;;  %s1346_s23 = scalar_lea.vmem %s2716_s17, %s2059_s26 [#allocation8]  ;;  %s1348_s21 = scalar_lea.vmem %s2718_s30, %s2059_s26 [#allocation9] }
 0x319   : >> { %2378 = vset.pattern.permute.xlu1 %v2506_v49 }
 0x31a   : >> { %1327 = vperm.xlu1 %2378, %v1151_v52   ;;  %2381 = vset.pattern.permute.xlu0 %v2509_v60 }
 0x31e   : >> { %2380 = vset.pattern.permute.xlu1 %v2507_v50 }
 0x37f   : >> { %v1110_v13 = vpop.permute.xlu1 %1109  ;;  %v1120_v15 = vpop.permute.xlu0 %1119 }
 0x380   : >> { %v1112_v14 = vadd.f32 %v1110_v13, %v1102_v12 }
 0x382   : >> { %v1122_v16 = vadd.f32 %v1120_v15, %v1112_v14 }
 0x383   : >> { %v1130_v18 = vpop.permute.xlu1 %1129 }
 0x384   : >> { %v2880_v19 = vadd.f32 %v1130_v18, %v1122_v16  ;;  %v1350_v16 = vstv %s1342_s20  ;;  %v1347_v18 = vld [vmem:[%s1346_s23] sm:$0xff] }
 0x386   : >> { %v1135_v20 = vmul.f32 %v2878_v17, %v2880_v19  ;;  %v1337_v11 = vmul.f32 0.33333334, %v2880_v19 }
 0x388   : >> { %v1136_v32 = vmul.f32 0.33333334, %v1135_v20  ;;  %v1349_v20 = vld [vmem:[%s1348_s21] sm:$0xff] }
 0x38a   : >> { %v1137_v33 = vadd.f32 %v2491_v40, %v1136_v32  ;;  %v1351_v32 = vmul.f32 %v1350_v16, %v1349_v20 }
 0x38c   : >> { %2152 = vmatmul.mubr.msk.f32.vlgmr.msra.gmra.mrb[2].mxu0 %vm942_vm6, %v1137_v33  ;;  %v1352_v33 = vadd.f32 %v1351_v32, %v1347_v18 }
 0x38d   : >> { %2246 = vmatpush3.bf16.msra.mxu0 %v2815_v43  ;;  %2173 = vmatprep.mubr.msk.f32.mxu0 %vm2504_vm5, %v2505_v47 }
 0x38e   : >> { %2247 = vmatprep.subr.bf16.mxu0 %v2503_v44  ;;  %v1353_v34 = vmul.f32 %v1352_v33, %v1350_v16 }
 0x390   : >> { %v1308_v0 = vpop.permute.xlu0 %1307 }
 0x391   : >> { %2249 = vmatpush3.bf16.msra.mxu0 %v2826_v46 }
 0x392   : >> { %2256 = vmatprep.subr.bf16.mxu0 %v2503_v44 }
 0x394   : >> { %v1318_v61 = vpop.permute.xlu1 %1317 }
 0x395   : >> { %v1303_v4 = vpop.permute.xlu0 %1302 }
 0x399   : >> { %v1328_v62 = vpop.permute.xlu1 %1327 }
 0x45f   : >> { %v1221_v53 = vpop.f32.mrb[2].mxu0 }
 0x460   : >> { %v1222_v54 = vadd.f32 %v2743_v25, %v1221_v53  ;;  %v2153_v55 = vpop.f32.mrb[3].mxu0 }
 0x462   : >> { %v1225_v56 = vmax.f32 %v1222_v54, 0.0 }
 0x464   : >> { %2163 = vmatmul.mubr.msk.f32.vlgmr.msra.gmra.mrb[2].mxu1 %vm942_vm6, %v1225_v56 }
 0x465   : >> { %2252 = vmatpush3.bf16.msra.mxu1 %v2821_v45  ;;  %2184 = vmatprep.mubr.msk.f32.mxu1 %vm2504_vm5, %v2505_v47 }
 0x466   : >> { %2253 = vmatprep.subr.bf16.mxu1 %v2503_v44 }
 0x469   : >> { %2255 = vmatpush3.bf16.msra.mxu1 %v2847_v48 }
 0x46a   : >> { %2262 = vmatprep.subr.bf16.mxu1 %v2503_v44 }
 0x537   : >> { %v1295_v57 = vpop.f32.mrb[2].mxu1 }
 0x538   : >> { %v1296_v58 = vadd.f32 %v2772_v31, %v1295_v57  ;;  %v2164_v60 = vpop.f32.mrb[3].mxu1 }
 0x53a   : >> { %2390 = vtanh.f32 %v1296_v58 }
 0x544   : >> { %v2391_v63 = vpop.eup %2390 }
 0x545   : >> { %v1310_v1 = vmul.f32 %v2391_v63, %v1308_v0  ;;  %v1330_v2 = vmul.f32 %v2391_v63, %v1328_v62  ;;  %v1320_v3 = vmul.f32 %v2391_v63, %v1318_v61  ;;  %v1305_v6 = vmul.f32 %v2391_v63, %v1303_v4 }
 0x547   : >> { %1332 = vrot.lane.b32.xlu0 %v1330_v2, %s3035_s28  ;;  %1312 = vrot.lane.b32.xlu1 %v1310_v1, %s2511_s29  ;;  %s1344_s28 = scalar_lea.vmem %s2714_s27, %s2059_s26 [#allocation7] }
 0x54b   : >> { %1322 = vrot.lane.b32.xlu1 %v1320_v3, %s3053_s18 }
 0x5b9   : >> { %v1313_v5 = vpop.permute.xlu1 %1312  ;;  %v1333_v10 = vpop.permute.xlu0 %1332 }
 0x5ba   : >> { %v1315_v7 = vadd.f32 %v1313_v5, %v1305_v6 }
 0x5bd   : >> { %v1323_v8 = vpop.permute.xlu1 %1322 }
 0x5be   : >> { %v1325_v9 = vadd.f32 %v1323_v8, %v1315_v7 }
 0x5c0   : >> { %v2913_v12 = vadd.f32 %v1333_v10, %v1325_v9 }
 0x5c2   : >> { %v1338_v13 = vsub.f32 %v2913_v12, %v1337_v11  ;;  %v1540_v7 = vsub.f32 %v2880_v19, %v2913_v12 }
 0x5c4   : >> { %v1339_v14 = vmul.f32 %v1338_v13, %v2878_v17 }
 0x5c6   : >> { %v1340_v15 = vadd.f32 %v2491_v40, %v1339_v14 }
 0x5c8   : >> { %2174 = vmatmul.mubr.msk.f32.vlgmr.msra.gmra.mrb[4].mxu0 %vm942_vm6, %v1340_v15 }
 0x5c9   : >> { %2258 = vmatpush3.bf16.msra.mxu0 %v2815_v43  ;;  %2195 = vmatprep.mubr.msk.f32.mxu0 %vm2504_vm5, %v2505_v47  ;;  %v1345_v43 = vld [vmem:[%s1344_s28] sm:$0xff]  ;;  %s1539_s28 = sadd.s32 3, %s2854_s25  ;;  %s3054_s25 = smov 32  }
 0x5ca   : >> { %2259 = vmatprep.subr.bf16.mxu0 %v2503_v44  ;;  %v1354_v36 = vadd.f32 %v1353_v34, %v1345_v43  ;;  %s1544_s24 = sld [smem:[#allocation2 + %s1539_s28]] }
 0x5cb   : >> { %s1545_s0 = sld [smem:[#allocation4 + %s1539_s28]] }
 0x5cc   : >> { %1510 = vperm.xlu1 %2380, %v1354_v36   ;;  %1520 = vperm.xlu0 %2381, %v1354_v36  }
 0x5cd   : >> { %2261 = vmatpush3.bf16.msra.mxu0 %v2826_v46 }
 0x5d0   : >> { %2382 = vset.pattern.permute.xlu1 %v2506_v49  ;;  %s2062_s20 = sshll.u32 %s1544_s24, 3 }
 0x5d1   : >> { %1530 = vperm.xlu1 %2382, %v1354_v36   ;;  %s1551_s26 = scalar_lea.vmem %s2718_s30, %s2062_s20 [#allocation9]  ;;  %s1549_s23 = scalar_lea.vmem %s2716_s17, %s2062_s20 [#allocation8] }
 0x5d2   : >> { %v1552_v52 = vld [vmem:[%s1551_s26] sm:$0xff]  ;;  %s1547_s21 = scalar_lea.vmem %s2714_s27, %s2062_s20 [#allocation7]  ;;  %s3056_s26 = sld [smem:[#allocation15_spill]] (%p914_p2) }
 0x5d3   : >> { %v1548_v60 = vld [vmem:[%s1547_s21] sm:$0xff] }
 0x5d5   : >> { %2383 = vset.pattern.permute.xlu1 %v2508_v59 }
 0x5d6   : >> { %1505 = vperm.xlu1 %2383, %v1354_v36  }
 0x5d8   : > { %v2065_v23 = vld [vmem:[%s3056_s26] ss:$0 sm:$0xff] (%p914_p2) }
 0x5da   : >> { %2384 = vset.pattern.permute.xlu1 %v2507_v50 }
 0x64b   : >> { %v1521_v55 = vpop.permute.xlu0 %1520 }
 0x69b   : >> { %v1424_v46 = vpop.f32.mrb[4].mxu0 }
 0x69c   : >> { %v1425_v37 = vadd.f32 %v2743_v25, %v1424_v46  ;;  %v2175_v38 = vpop.f32.mrb[5].mxu0  ;;  %v1750_v46 = vstv %s2958_s15 }
 0x69d   : >> { %vm1751_vm7 = vcmp.eq.s32.totalorder %v2792_v35, %v1750_v46 }
 0x69e   : >> { %v1428_v39 = vmax.f32 %v1425_v37, 0.0 }
 0x6a0   : >> { %2185 = vmatmul.mubr.msk.f32.vlgmr.msra.gmra.mrb[4].mxu1 %vm942_vm6, %v1428_v39  ;;  %v1752_v39 = vsel %vm1751_vm7, 1, %v2508_v59 }
 0x6a1   : >> { %2264 = vmatpush3.bf16.msra.mxu1 %v2821_v45  ;;  %2206 = vmatprep.mubr.msk.f32.mxu1 %vm2504_vm5, %v2505_v47  ;;  %v1553_v45 = vstv %s1545_s0  ;;  %v1550_v47 = vld [vmem:[%s1549_s23] sm:$0xff] }
 0x6a2   : >> { %2265 = vmatprep.subr.bf16.mxu1 %v2503_v44  ;;  %v1554_v53 = vmul.f32 %v1553_v45, %v1552_v52  ;;  %v1511_v44 = vpop.permute.xlu1 %1510 }
 0x6a4   : >> { %v1555_v54 = vadd.f32 %v1554_v53, %v1550_v47 }
 0x6a5   : >> { %2267 = vmatpush3.bf16.msra.mxu1 %v2847_v48 }
 0x6a6   : >> { %v1556_v58 = vmul.f32 %v1555_v54, %v1553_v45  ;;  %v1531_v61 = vpop.permute.xlu1 %1530 }
 0x6a8   : >> { %v1557_v63 = vadd.f32 %v1556_v58, %v1548_v60 }
 0x6aa   : >> { %v1506_v0 = vpop.permute.xlu1 %1505 }
 0x773   : >> { %v1498_v50 = vpop.f32.mrb[4].mxu1 }
 0x774   : >> { %v1499_v41 = vadd.f32 %v2772_v31, %v1498_v50  ;;  %v2186_v51 = vpop.f32.mrb[5].mxu1 }
 0x776   : >> { %2392 = vtanh.f32 %v1499_v41 }
 0x780   : >> { %v2393_v48 = vpop.eup %2392 }
 0x781   : >> { %v1513_v56 = vmul.f32 %v2393_v48, %v1511_v44  ;;  %v1523_v57 = vmul.f32 %v2393_v48, %v1521_v55  ;;  %v1533_v62 = vmul.f32 %v2393_v48, %v1531_v61  ;;  %v1508_v1 = vmul.f32 %v2393_v48, %v1506_v0 }
 0x783   : >> { %1525 = vrot.lane.b32.xlu1 %v1523_v57, %s3053_s18  ;;  %1515 = vrot.lane.b32.xlu0 %v1513_v56, %s2511_s29 }
 0x787   : >> { %1535 = vrot.lane.b32.xlu0 %v1533_v62, %s3054_s25  ;;  %1713 = vperm.xlu1 %2384, %v1557_v63  }
 0x78b   : >> { %1723 = vperm.xlu0 %2381, %v1557_v63   ;;  %2385 = vset.pattern.permute.xlu1 %v2506_v49 }
 0x78c   : >> { %1733 = vperm.xlu1 %2385, %v1557_v63  }
 0x78f   : >> { %2386 = vset.pattern.permute.xlu0 %v2508_v59 }
 0x790   : >> { %1708 = vperm.xlu0 %2386, %v1557_v63   ;;  %2387 = vset.pattern.permute.xlu1 %v2508_v59 }
 0x7f5   : >> { %v1516_v2 = vpop.permute.xlu0 %1515  ;;  %v1526_v4 = vpop.permute.xlu1 %1525 }
 0x7f6   : >> { %v1518_v3 = vadd.f32 %v1516_v2, %v1508_v1 }
 0x7f8   : >> { %v1528_v5 = vadd.f32 %v1526_v4, %v1518_v3 }
 0x7f9   : >> { %v1536_v6 = vpop.permute.xlu0 %1535 }
 0x7fa   : >> { %v1538_v8 = vadd.f32 %v1536_v6, %v1528_v5 }
 0x7fc   : >> { %v1541_v9 = vadd.f32 %v1540_v7, %v1538_v8  ;;  %v1742_v41 = vadd.f32 %v1538_v8, %v2913_v12  ;;  %v1760_v12 = vld [vmem:[%s3026_s14 + $0x10] sm:$0xff] (%p914_p2) }
 0x7fd   : > { %v2272_v22 = vpack.c.bf16 (%p914_p2), %v1761_v21, %v1760_v12 }
 0x7fe   : >> { %v1542_v49 = vmul.f32 %v1541_v9, %v2878_v17  ;;  %v1743_v45 = vmul.f32 3.0, %v1742_v41 }
 0x800   : >> { %v1543_v10 = vadd.f32 %v2491_v40, %v1542_v49  ;;  %v1744_v55 = vadd.f32 %v1743_v45, %v2880_v19  ;;  %v1759_v19 = vld [vmem:[%s3026_s14 + $0x8] sm:$0xff] (%p914_p2) }
 0x802   : >> { %2196 = vmatmul.mubr.msk.f32.vlgmr.msra.gmra.mrb[6].mxu0 %vm942_vm6, %v1543_v10 }
 0x803   : > { %2217 = vmatprep.mubr.msk.f32.mxu0 (%p914_p2), %vm2501_vm1, %v2500_v27 }
 0x806   : >> { %v1714_v32 = vpop.permute.xlu1 %1713 }
 0x80a   : >> { %v1724_v37 = vpop.permute.xlu0 %1723 }
 0x80b   : >> { %v1734_v33 = vpop.permute.xlu1 %1733 }
 0x80f   : >> { %v1709_v50 = vpop.permute.xlu0 %1708 }
 0x8d5   : >> { %v1627_v11 = vpop.f32.mrb[6].mxu0 }
 0x8d6   : >> { %v1628_v13 = vadd.f32 %v2743_v25, %v1627_v11  ;;  %v2197_v14 = vpop.f32.mrb[7].mxu0 }
 0x8d8   : >> { %v1631_v15 = vmax.f32 %v1628_v13, 0.0 }
 0x8da   : >> { %2207 = vmatmul.mubr.msk.f32.vlgmr.msra.gmra.mrb[6].mxu1 %vm942_vm6, %v1631_v15 }
 0x9ad   : >> { %v1701_v16 = vpop.f32.mrb[6].mxu1 }
 0x9ae   : >> { %v1702_v18 = vadd.f32 %v2772_v31, %v1701_v16  ;;  %v2208_v20 = vpop.f32.mrb[7].mxu1 }
 0x9b0   : >> { %2394 = vtanh.f32 %v1702_v18 }
 0x9ba   : >> { %v2395_v43 = vpop.eup %2394 }
 0x9bb   : >> { %v1716_v34 = vmul.f32 %v2395_v43, %v1714_v32  ;;  %v1736_v36 = vmul.f32 %v2395_v43, %v1734_v33  ;;  %v1726_v38 = vmul.f32 %v2395_v43, %v1724_v37  ;;  %v1711_v52 = vmul.f32 %v2395_v43, %v1709_v50 }
 0x9bd   : >> { %1738 = vrot.lane.b32.xlu0 %v1736_v36, %s3054_s25  ;;  %1718 = vrot.lane.b32.xlu1 %v1716_v34, %s2511_s29  ;;  %s3057_s25 = scalar_lea.vmem (%p914_p2), %s3028_s16, %s2778_s19 }
 0x9c1   : >> { %1728 = vrot.lane.b32.xlu1 %v1726_v38, %s3053_s18 }
 0x9c5   : >> { %1754 = vperm.xlu1 %2387, %v1752_v39  }
 0xa2f   : >> { %v1719_v51 = vpop.permute.xlu1 %1718  ;;  %v1739_v44 = vpop.permute.xlu0 %1738 }
 0xa30   : >> { %v1721_v53 = vadd.f32 %v1719_v51, %v1711_v52 }
 0xa33   : >> { %v1729_v47 = vpop.permute.xlu1 %1728 }
 0xa34   : >> { %v1731_v54 = vadd.f32 %v1729_v47, %v1721_v53 }
 0xa36   : >> { %v1741_v48 = vadd.f32 %v1739_v44, %v1731_v54 }
 0xa38   : >> { %v1745_v56 = vadd.f32 %v1744_v55, %v1741_v48 }
 0xa3a   : >> { %v1746_v57 = vmul.f32 %v1745_v56, %v2878_v17  ;;  %v1758_v17 = vld [vmem:[%s3026_s14] sm:$0xff] (%p914_p2) }
 0xa3b   : > { %v2269_v61 = vpack.c.bf16 (%p914_p2), %v1759_v19, %v1758_v17 }
 0xa3c   : >> { %v1747_v58 = vmul.f32 0.125, %v1746_v57 }
 0xa3e   : >> { %v1748_v40 = vadd.f32 %v2491_v40, %v1747_v58  }
 0xa41   : > { %916 = sbr.rel (!%p914_p2) target bundleno = 329 (0x149), region = 287 }
 0xa44   : >> { %v1755_v60 = vpop.permute.xlu1 %1754 }
 0xa45   : >> { %vm1756_vm8 = vcmp.eq.s32.totalorder %v1755_v60, 1 }
 0xa46   : >> { %v1757_v59 = vsel %vm1756_vm8, %v1748_v40, %v2487_v42   ;;  %v2513_v40 = vmov (%p914_p2), 0.0|0.0  }
 0xa47   : >> { %v3055_v42 = vmov %v1757_v59  ;;  %2268 = vmatprep.subr.bf16.mxu0 (%p914_p2), %v2513_v40 }
 0xa48   : > { %2270 = vmatpush3.bf16.msra.mxu0 %v2269_v61 }
 0xa49   : > { %2271 = vmatprep.subr.bf16.mxu0 %v2513_v40 }
 0xa4c   : > { %2273 = vmatpush3.bf16.msra.mxu0 %v2272_v22 }
 0xa4f   : > { %2218 = vmatmul.mubr.msk.f32.vlgmr.msra.gmra.mrb[0].mxu0 %vm942_vm6, %v1757_v59 }
 0xb22   : > { %v1839_v24 = vpop.f32.mrb[0].mxu0 }
 0xb23   : > { %v1840_v25 = vadd.f32 %v2065_v23, %v1839_v24  ;;  %v2219_v26 = vpop.f32.mrb[1].mxu0 }
 0xb25   : > { %1844 = vst.msk [vmem:[%s3057_s25] sm:$0xff] %vm1843_vm9, %v1840_v25 }
 0xb26 PF: > { %s3058_s23 = sld [smem:[#allocation12_spill]]  ;;  %s3059_s29 = sld [smem:[#allocation13_spill]] }
 0xb27   : > { %s3060_s21 = smov %s2479_s22 }
 0xb2c   : > { %p25_p3 = scmp.ge.s32.totalorder %s3058_s23, 4   ;;  %s3061_s22 = smov %s3059_s29 }
 0xb2e   :  { %27 = sbr.rel (!%p25_p3) target bundleno = 6 (0x6), region = 298 }
 0xb35   :  { %1864 = vsyncpa [#allocation3], 1 }
 0xb36   :  { %1866 = vsyncpa [#allocation3 + $0x1], 1 }
 0xb37   :  { %1867 = vsyncpa [#allocation5], 1 }

</bundles_post_ra>
